<compile_context>
chip_gen: v7x
topology: tpu7x:2x2x1
jax: 0.10.0
libtpu: 0.0.40
codegen_flags: <defaults>
</compile_context>

<pallas_src>
from functools import partial

import jax
import jax.numpy as jnp
from jax.experimental import pallas as pl
from jax.experimental.pallas import tpu as pltpu


def mca_kernel(x_ref, comp_ref, wq_ref, wkv_ref, wp_ref, bp_ref, out_ref, *,
               num_heads, flat_out):
    # x_ref:    (Bt, N_x, C)    f32 query-side inputs for this batch tile
    # comp_ref: (Bt, N_comp, C) f32 raw complement (NOT pre-concatenated)
    # wq_ref:   (C, C)    bf16, softmax scale pre-folded
    # wkv_ref:  (2, C, C) bf16, [W_k, W_v] stacked on the leading axis
    # wp_ref:   (C, C)    bf16
    # bp_ref:   (1, C)    f32
    Bt, N_x, C = x_ref.shape
    N_comp = comp_ref.shape[1]
    N_c = N_x + N_comp
    H = num_heads
    hd = C // H

    x_f32 = x_ref[...]                                  # keep f32 for residual
    xb = x_f32.astype(jnp.bfloat16)
    cb = comp_ref[...].astype(jnp.bfloat16)

    # Concatenate the *inputs* in VMEM; K/V of cat([x, comp]) == this.
    xcb = jnp.concatenate([xb, cb], axis=1)             # (Bt, N_c, C) bf16
    xc2 = xcb.reshape(Bt * N_c, C)
    xq2 = xb.reshape(Bt * N_x, C)

    # ---- projections: bf16 MXU inputs, f32 accumulation --------------------
    q = jnp.dot(xq2, wq_ref[...], preferred_element_type=jnp.float32)   # (BtN_x, C)
    k = jnp.dot(xc2, wkv_ref[0], preferred_element_type=jnp.float32)    # (BtN_c, C)
    v = jnp.dot(xc2, wkv_ref[1], preferred_element_type=jnp.float32)    # (BtN_c, C)

    # ---- split heads: (Bt*N, C) -> (Bt*H, N, hd), single leading batch -----
    def split_heads(t, n):
        t = t.astype(jnp.bfloat16).reshape(Bt, n, H, hd)
        return jnp.transpose(t, (0, 2, 1, 3)).reshape(Bt * H, n, hd)

    qh = split_heads(q, N_x)
    kh = split_heads(k, N_c)
    vh = split_heads(v, N_c)

    # ---- attention scores, batched over Bt*H (MXU) -------------------------
    scores = jnp.einsum('gqd,gkd->gqk', qh, kh,
                        preferred_element_type=jnp.float32)             # (G, N_x, N_c)

    # ---- numerically stable softmax (f32); normalize AFTER the PV matmul ---
    m = jnp.max(scores, axis=-1, keepdims=True)
    e = jnp.exp(scores - m)                                             # unnormalized
    s = jnp.sum(e, axis=-1, keepdims=True)                              # (G, N_x, 1)

    o = jnp.einsum('gqk,gkd->gqd', e.astype(jnp.bfloat16), vh,
                   preferred_element_type=jnp.float32)                  # (G, N_x, hd)
    o = o * pl.reciprocal(s, approx=True)        # attn_drop = 0 -> identity

    # ---- merge heads, residual (pre-projection, per the module) ------------
    om = jnp.transpose(o.reshape(Bt, H, N_x, hd), (0, 2, 1, 3)).reshape(Bt * N_x, C)
    om = om + x_f32.reshape(Bt * N_x, C)

    # ---- output projection (+ bias); proj_drop = 0 -> identity -------------
    out = jnp.dot(om.astype(jnp.bfloat16), wp_ref[...],
                  preferred_element_type=jnp.float32) + bp_ref[...]

    if flat_out:
        out_ref[...] = out.reshape(Bt, N_x * C).astype(out_ref.dtype)
    else:
        out_ref[...] = out.reshape(Bt, N_x, C).astype(out_ref.dtype)


def multi_head_cross_attention(x, complement, wq, wkv, wp, bp, num_heads,
                               batch_tile=None):
    B, N_x, C = x.shape
    _, N_comp, _ = complement.shape
    assert C % num_heads == 0
    hd = C // num_heads
    scale = hd ** (-0.5)

    # Fold softmax scale into W_q in f32, then cast ONCE to bf16.
    wq_s = (wq.astype(jnp.float32) * scale).astype(jnp.bfloat16)
    # Stack to_kv as (2, C, C) so the kernel never lane-slices kv[:, :C].
    wkv_s = jnp.stack([wkv[:, :C], wkv[:, C:]], axis=0).astype(jnp.bfloat16)
    wp_b = wp.astype(jnp.bfloat16)
    bp_f = bp.astype(jnp.float32).reshape(1, C)

    if batch_tile is None:
        # Largest batch block that still leaves >= 2 grid steps (both v7x TCs).
        batch_tile = 1
        for d in range(B, 0, -1):
            if B % d == 0 and B // d >= 2:
                batch_tile = d
                break
    assert B % batch_tile == 0
    Bt = batch_tile
    grid = (B // Bt,)

    prefer_flat = (C % 128 != 0) and ((N_x * C) % 128 == 0)

    def build(buffered, flat):
        def wspec(shape, imap):
            if buffered:
                return pl.BlockSpec(shape, imap, pipeline_mode=pl.Buffered(1))
            return pl.BlockSpec(shape, imap)

        in_specs = [
            pl.BlockSpec((Bt, N_x, C), lambda b: (b, 0, 0)),      # x
            pl.BlockSpec((Bt, N_comp, C), lambda b: (b, 0, 0)),   # complement (raw)
            wspec((C, C), lambda b: (0, 0)),                      # W_q (pre-scaled)
            wspec((2, C, C), lambda b: (0, 0, 0)),                # [W_k, W_v]
            wspec((C, C), lambda b: (0, 0)),                      # W_proj
            wspec((1, C), lambda b: (0, 0)),                      # b_proj
        ]
        if flat:
            out_shape = jax.ShapeDtypeStruct((B, N_x * C), x.dtype)
            out_spec = pl.BlockSpec((Bt, N_x * C), lambda b: (b, 0))
        else:
            out_shape = jax.ShapeDtypeStruct((B, N_x, C), x.dtype)
            out_spec = pl.BlockSpec((Bt, N_x, C), lambda b: (b, 0, 0))

        return pl.pallas_call(
            partial(mca_kernel, num_heads=num_heads, flat_out=flat),
            out_shape=out_shape,
            grid=grid,
            in_specs=in_specs,
            out_specs=out_spec,
            compiler_params=pltpu.CompilerParams(
                dimension_semantics=("parallel",),
                vmem_limit_bytes=32 * 1024 * 1024,
            ),
        )

    # Preferred config first; fall back gracefully on JAX/Mosaic versions that
    # reject Buffered(1) weight specs or the lane-dense output reshape.
    configs, seen = [], set()
    for cfg in [(True, prefer_flat), (True, False), (False, prefer_flat), (False, False)]:
        if cfg not in seen:
            seen.add(cfg)
            configs.append(cfg)

    last_err = None
    for buffered, flat in configs:
        try:
            out = build(buffered, flat)(x, complement, wq_s, wkv_s, wp_b, bp_f)
            out = jax.block_until_ready(out)
            if flat:
                out = out.reshape(B, N_x, C)
            return out
        except Exception as err:   # pragma: no cover - version-dependent fallback
            last_err = err
    raise last_err


def reference_forward(x, complement, wq, wkv, wp, bp, num_heads):
    """Pure-JAX (f32) reference mirroring the PyTorch forward exactly."""
    B, N_x, C = x.shape
    comp = jnp.concatenate([x, complement], axis=1)
    N_c = comp.shape[1]
    hd = C // num_heads
    scale = hd ** (-0.5)
    q = (x @ wq).reshape(B, N_x, num_heads, hd).transpose(0, 2, 1, 3)
    kv = (comp @ wkv).reshape(B, N_c, 2, num_heads, hd).transpose(2, 0, 3, 1, 4)
    k, v = kv[0], kv[1]
    attn = jax.nn.softmax(jnp.einsum('bhqd,bhkd->bhqk', q, k) * scale, axis=-1)
    o = jnp.einsum('bhqk,bhkd->bhqd', attn, v).transpose(0, 2, 1, 3).reshape(B, N_x, C)
    o = o + x
    return o @ wp + bp


if __name__ == "__main__":
    # Small shapes consistent with the module: dim=C=32, num_heads=4, head_dim=8.
    B, N_x, N_comp, C, H = 2, 8, 8, 32, 4

    key = jax.random.PRNGKey(0)
    kx, kc, kq, kkv, kp, kb = jax.random.split(key, 6)

    x = jax.random.normal(kx, (B, N_x, C), dtype=jnp.float32)
    complement = jax.random.normal(kc, (B, N_comp, C), dtype=jnp.float32)

    # Deterministic parameter init (shapes from the module's __init__).
    wq = 0.05 * jax.random.normal(kq, (C, C), dtype=jnp.float32)          # to_q
    wkv = 0.05 * jax.random.normal(kkv, (C, 2 * C), dtype=jnp.float32)    # to_kv (fused)
    wp = 0.05 * jax.random.normal(kp, (C, C), dtype=jnp.float32)          # proj weight
    bp = 0.05 * jax.random.normal(kb, (1, C), dtype=jnp.float32)          # proj bias

    out = multi_head_cross_attention(x, complement, wq, wkv, wp, bp, H)
    out = jax.block_until_ready(out)

    ref = reference_forward(x, complement, wq, wkv, wp, bp, H)
    assert out.shape == (B, N_x, C)
    # Tolerance covers bf16 MXU inputs + approx reciprocal in the softmax denom.
    assert jnp.allclose(out, ref, atol=2e-2, rtol=2e-2), "mismatch vs reference"

    print("KERNEL_OK")
</pallas_src>

<mosaic_0001>
module attributes {stable_mosaic.version = 11 : i64} {
  func.func @mca_kernel(%arg0: i32, %arg1: memref<1x8x32xf32, #tpu.memory_space<vmem>>, %arg2: memref<1x8x32xf32, #tpu.memory_space<vmem>>, %arg3: memref<32x32xbf16, #tpu.memory_space<vmem>>, %arg4: memref<2x32x32xbf16, #tpu.memory_space<vmem>>, %arg5: memref<32x32xbf16, #tpu.memory_space<vmem>>, %arg6: memref<1x32xf32, #tpu.memory_space<vmem>>, %arg7: memref<1x8x32xf32, #tpu.memory_space<vmem>>) attributes {dimension_semantics = [#tpu.dimension_semantics<parallel>], iteration_bounds = array<i64: 2>, scalar_prefetch = 0 : i64, scratch_operands = 0 : i64, tpu.core_type = #tpu.core_type<tc>, window_params = [{transform_indices = @transform_0, window_bounds = array<i64: 1, 8, 32>}, {transform_indices = @transform_1, window_bounds = array<i64: 1, 8, 32>}, {pipeline_mode = #tpu.pipeline_mode<synchronous>, transform_indices = @transform_2, window_bounds = array<i64: 32, 32>}, {pipeline_mode = #tpu.pipeline_mode<synchronous>, transform_indices = @transform_3, window_bounds = array<i64: 2, 32, 32>}, {pipeline_mode = #tpu.pipeline_mode<synchronous>, transform_indices = @transform_4, window_bounds = array<i64: 32, 32>}, {pipeline_mode = #tpu.pipeline_mode<synchronous>, transform_indices = @transform_5, window_bounds = array<i64: 1, 32>}, {transform_indices = @transform_6, window_bounds = array<i64: 1, 8, 32>}]} {
    %c0 = arith.constant 0 : index
    %c0_0 = arith.constant 0 : index
    %c0_1 = arith.constant 0 : index
    %0 = vector.load %arg1[%c0, %c0_0, %c0_1] : memref<1x8x32xf32, #tpu.memory_space<vmem>>, vector<1x8x32xf32>
    %1 = arith.truncf %0 : vector<1x8x32xf32> to vector<1x8x32xbf16>
    %c0_2 = arith.constant 0 : index
    %c0_3 = arith.constant 0 : index
    %c0_4 = arith.constant 0 : index
    %2 = vector.load %arg2[%c0_2, %c0_3, %c0_4] : memref<1x8x32xf32, #tpu.memory_space<vmem>>, vector<1x8x32xf32>
    %3 = arith.truncf %2 : vector<1x8x32xf32> to vector<1x8x32xbf16>
    %4 = tpu.concatenate %1, %3 in 1 : vector<1x8x32xbf16>, vector<1x8x32xbf16> -> vector<1x16x32xbf16>
    %5 = vector.shape_cast %4 : vector<1x16x32xbf16> to vector<16x32xbf16>
    %6 = vector.shape_cast %1 : vector<1x8x32xbf16> to vector<8x32xbf16>
    %c0_5 = arith.constant 0 : index
    %c0_6 = arith.constant 0 : index
    %7 = vector.load %arg3[%c0_5, %c0_6] : memref<32x32xbf16, #tpu.memory_space<vmem>>, vector<32x32xbf16>
    %cst = arith.constant dense<0.000000e+00> : vector<8x32xf32>
    %8 = tpu.matmul %6, %7, %cst {dimension_numbers = #tpu.dot_dimension_numbers<[1], [0], [0], [1], [0, 0, 1, 1], [], []>} : vector<8x32xbf16>, vector<32x32xbf16>, vector<8x32xf32> -> vector<8x32xf32>
    %c0_7 = arith.constant 0 : index
    %c0_8 = arith.constant 0 : index
    %c0_9 = arith.constant 0 : index
    %9 = vector.load %arg4[%c0_7, %c0_8, %c0_9] : memref<2x32x32xbf16, #tpu.memory_space<vmem>>, vector<1x32x32xbf16>
    %10 = vector.shape_cast %9 : vector<1x32x32xbf16> to vector<32x32xbf16>
    %cst_10 = arith.constant dense<0.000000e+00> : vector<16x32xf32>
    %11 = tpu.matmul %5, %10, %cst_10 {dimension_numbers = #tpu.dot_dimension_numbers<[1], [0], [0], [1], [0, 0, 1, 1], [], []>} : vector<16x32xbf16>, vector<32x32xbf16>, vector<16x32xf32> -> vector<16x32xf32>
    %c1 = arith.constant 1 : index
    %c0_11 = arith.constant 0 : index
    %c0_12 = arith.constant 0 : index
    %12 = vector.load %arg4[%c1, %c0_11, %c0_12] : memref<2x32x32xbf16, #tpu.memory_space<vmem>>, vector<1x32x32xbf16>
    %13 = vector.shape_cast %12 : vector<1x32x32xbf16> to vector<32x32xbf16>
    %cst_13 = arith.constant dense<0.000000e+00> : vector<16x32xf32>
    %14 = tpu.matmul %5, %13, %cst_13 {dimension_numbers = #tpu.dot_dimension_numbers<[1], [0], [0], [1], [0, 0, 1, 1], [], []>} : vector<16x32xbf16>, vector<32x32xbf16>, vector<16x32xf32> -> vector<16x32xf32>
    %15 = arith.truncf %8 : vector<8x32xf32> to vector<8x32xbf16>
    %16 = vector.shape_cast %15 : vector<8x32xbf16> to vector<1x8x4x8xbf16>
    %17 = tpu.transpose %16, [0, 2, 1, 3] : vector<1x8x4x8xbf16> -> vector<1x4x8x8xbf16>
    %18 = vector.shape_cast %17 : vector<1x4x8x8xbf16> to vector<4x8x8xbf16>
    %19 = arith.truncf %11 : vector<16x32xf32> to vector<16x32xbf16>
    %20 = vector.shape_cast %19 : vector<16x32xbf16> to vector<1x16x4x8xbf16>
    %21 = tpu.transpose %20, [0, 2, 1, 3] : vector<1x16x4x8xbf16> -> vector<1x4x16x8xbf16>
    %22 = vector.shape_cast %21 : vector<1x4x16x8xbf16> to vector<4x16x8xbf16>
    %23 = arith.truncf %14 : vector<16x32xf32> to vector<16x32xbf16>
    %24 = vector.shape_cast %23 : vector<16x32xbf16> to vector<1x16x4x8xbf16>
    %25 = tpu.transpose %24, [0, 2, 1, 3] : vector<1x16x4x8xbf16> -> vector<1x4x16x8xbf16>
    %26 = vector.shape_cast %25 : vector<1x4x16x8xbf16> to vector<4x16x8xbf16>
    "tpu.trace_start"() <{level = 10 : i32, message = "gqd,gkd->gqk"}> : () -> ()
    %cst_14 = arith.constant dense<0.000000e+00> : vector<4x8x16xf32>
    %27 = tpu.matmul %18, %22, %cst_14 {dimension_numbers = #tpu.dot_dimension_numbers<[2], [2], [1], [1], [0, 0, 0, 1, 1, 1], [0], [0]>} : vector<4x8x8xbf16>, vector<4x16x8xbf16>, vector<4x8x16xf32> -> vector<4x8x16xf32>
    "tpu.trace_stop"() : () -> ()
    %cst_15 = arith.constant dense<0xFF800000> : vector<4x8xf32>
    %28 = vector.multi_reduction <maximumf>, %27, %cst_15 [2] : vector<4x8x16xf32> to vector<4x8xf32>
    %29 = vector.shape_cast %28 : vector<4x8xf32> to vector<4x8x1xf32>
    %30 = vector.broadcast %29 : vector<4x8x1xf32> to vector<4x8x16xf32>
    %31 = arith.subf %27, %30 : vector<4x8x16xf32>
    %32 = math.exp %31 : vector<4x8x16xf32>
    %cst_16 = arith.constant dense<0.000000e+00> : vector<4x8xf32>
    %33 = vector.multi_reduction <add>, %32, %cst_16 [2] : vector<4x8x16xf32> to vector<4x8xf32>
    %34 = vector.shape_cast %33 : vector<4x8xf32> to vector<4x8x1xf32>
    %35 = arith.truncf %32 : vector<4x8x16xf32> to vector<4x8x16xbf16>
    "tpu.trace_start"() <{level = 10 : i32, message = "gqk,gkd->gqd"}> : () -> ()
    %cst_17 = arith.constant dense<0.000000e+00> : vector<4x8x8xf32>
    %36 = tpu.matmul %35, %26, %cst_17 {dimension_numbers = #tpu.dot_dimension_numbers<[2], [1], [1], [2], [0, 0, 0, 1, 1, 2], [0], [0]>} : vector<4x8x16xbf16>, vector<4x16x8xbf16>, vector<4x8x8xf32> -> vector<4x8x8xf32>
    "tpu.trace_stop"() : () -> ()
    %37 = tpu.reciprocal %34 {approx = true} : vector<4x8x1xf32> -> vector<4x8x1xf32>
    %38 = vector.broadcast %37 : vector<4x8x1xf32> to vector<4x8x8xf32>
    %39 = arith.mulf %36, %38 : vector<4x8x8xf32>
    %40 = vector.shape_cast %39 : vector<4x8x8xf32> to vector<1x4x8x8xf32>
    %41 = tpu.transpose %40, [0, 2, 1, 3] : vector<1x4x8x8xf32> -> vector<1x8x4x8xf32>
    %42 = vector.shape_cast %41 : vector<1x8x4x8xf32> to vector<8x32xf32>
    %43 = vector.shape_cast %0 : vector<1x8x32xf32> to vector<8x32xf32>
    %44 = arith.addf %42, %43 : vector<8x32xf32>
    %45 = arith.truncf %44 : vector<8x32xf32> to vector<8x32xbf16>
    %c0_18 = arith.constant 0 : index
    %c0_19 = arith.constant 0 : index
    %46 = vector.load %arg5[%c0_18, %c0_19] : memref<32x32xbf16, #tpu.memory_space<vmem>>, vector<32x32xbf16>
    %cst_20 = arith.constant dense<0.000000e+00> : vector<8x32xf32>
    %47 = tpu.matmul %45, %46, %cst_20 {dimension_numbers = #tpu.dot_dimension_numbers<[1], [0], [0], [1], [0, 0, 1, 1], [], []>} : vector<8x32xbf16>, vector<32x32xbf16>, vector<8x32xf32> -> vector<8x32xf32>
    %c0_21 = arith.constant 0 : index
    %c0_22 = arith.constant 0 : index
    %48 = vector.load %arg6[%c0_21, %c0_22] : memref<1x32xf32, #tpu.memory_space<vmem>>, vector<1x32xf32>
    %49 = vector.broadcast %48 : vector<1x32xf32> to vector<8x32xf32>
    %50 = arith.addf %47, %49 : vector<8x32xf32>
    %51 = vector.shape_cast %50 : vector<8x32xf32> to vector<1x8x32xf32>
    %c0_23 = arith.constant 0 : index
    %c0_24 = arith.constant 0 : index
    %c0_25 = arith.constant 0 : index
    %52 = vector.load %arg7[%c0_23, %c0_24, %c0_25] : memref<1x8x32xf32, #tpu.memory_space<vmem>>, vector<1x8x32xf32>
    tpu.vector_store %arg7[%c0_23, %c0_24, %c0_25], %51 {strides = array<i32>} : memref<1x8x32xf32, #tpu.memory_space<vmem>>, vector<1x8x32xf32>,
    return
  }
  func.func @transform_0(%arg0: i32) -> (i32, i32, i32) {
    %c0_i32 = arith.constant 0 : i32
    %c0_i32_0 = arith.constant 0 : i32
    %c0_i32_1 = arith.constant 0 : i32
    return %arg0, %c0_i32, %c0_i32_0 : i32, i32, i32
  }
  func.func @transform_1(%arg0: i32) -> (i32, i32, i32) {
    %c0_i32 = arith.constant 0 : i32
    %c0_i32_0 = arith.constant 0 : i32
    %c0_i32_1 = arith.constant 0 : i32
    return %arg0, %c0_i32, %c0_i32_0 : i32, i32, i32
  }
  func.func @transform_2(%arg0: i32) -> (i32, i32) {
    %c0_i32 = arith.constant 0 : i32
    %c0_i32_0 = arith.constant 0 : i32
    %c0_i32_1 = arith.constant 0 : i32
    return %c0_i32, %c0_i32_0 : i32, i32
  }
  func.func @transform_3(%arg0: i32) -> (i32, i32, i32) {
    %c0_i32 = arith.constant 0 : i32
    %c0_i32_0 = arith.constant 0 : i32
    %c0_i32_1 = arith.constant 0 : i32
    %c0_i32_2 = arith.constant 0 : i32
    return %c0_i32, %c0_i32_0, %c0_i32_1 : i32, i32, i32
  }
  func.func @transform_4(%arg0: i32) -> (i32, i32) {
    %c0_i32 = arith.constant 0 : i32
    %c0_i32_0 = arith.constant 0 : i32
    %c0_i32_1 = arith.constant 0 : i32
    return %c0_i32, %c0_i32_0 : i32, i32
  }
  func.func @transform_5(%arg0: i32) -> (i32, i32) {
    %c0_i32 = arith.constant 0 : i32
    %c0_i32_0 = arith.constant 0 : i32
    %c0_i32_1 = arith.constant 0 : i32
    return %c0_i32, %c0_i32_0 : i32, i32
  }
  func.func @transform_6(%arg0: i32) -> (i32, i32, i32) {
    %c0_i32 = arith.constant 0 : i32
    %c0_i32_0 = arith.constant 0 : i32
    %c0_i32_1 = arith.constant 0 : i32
    return %arg0, %c0_i32, %c0_i32_0 : i32, i32, i32
  }
}

module attributes {stable_mosaic.version = 11 : i64} {
  func.func @mca_kernel(%arg0: i32, %arg1: memref<1x8x32xf32, #tpu.memory_space<vmem>>, %arg2: memref<1x8x32xf32, #tpu.memory_space<vmem>>, %arg3: memref<32x32xbf16, #tpu.memory_space<vmem>>, %arg4: memref<2x32x32xbf16, #tpu.memory_space<vmem>>, %arg5: memref<32x32xbf16, #tpu.memory_space<vmem>>, %arg6: memref<1x32xf32, #tpu.memory_space<vmem>>, %arg7: memref<1x8x32xf32, #tpu.memory_space<vmem>>) attributes {dimension_semantics = [#tpu.dimension_semantics<parallel>], iteration_bounds = array<i64: 2>, scalar_prefetch = 0 : i64, scratch_operands = 0 : i64, tpu.core_type = #tpu.core_type<tc>, window_params = [{transform_indices = @transform_0, window_bounds = array<i64: 1, 8, 32>}, {transform_indices = @transform_1, window_bounds = array<i64: 1, 8, 32>}, {pipeline_mode = #tpu.pipeline_mode<synchronous>, transform_indices = @transform_2, window_bounds = array<i64: 32, 32>}, {pipeline_mode = #tpu.pipeline_mode<synchronous>, transform_indices = @transform_3, window_bounds = array<i64: 2, 32, 32>}, {pipeline_mode = #tpu.pipeline_mode<synchronous>, transform_indices = @transform_4, window_bounds = array<i64: 32, 32>}, {pipeline_mode = #tpu.pipeline_mode<synchronous>, transform_indices = @transform_5, window_bounds = array<i64: 1, 32>}, {transform_indices = @transform_6, window_bounds = array<i64: 1, 8, 32>}]} {
    %c0 = arith.constant 0 : index
    %c0_0 = arith.constant 0 : index
    %c0_1 = arith.constant 0 : index
    %0 = vector.load %arg1[%c0, %c0_0, %c0_1] : memref<1x8x32xf32, #tpu.memory_space<vmem>>, vector<1x8x32xf32>
    %1 = arith.truncf %0 : vector<1x8x32xf32> to vector<1x8x32xbf16>
    %c0_2 = arith.constant 0 : index
    %c0_3 = arith.constant 0 : index
    %c0_4 = arith.constant 0 : index
    %2 = vector.load %arg2[%c0_2, %c0_3, %c0_4] : memref<1x8x32xf32, #tpu.memory_space<vmem>>, vector<1x8x32xf32>
    %3 = arith.truncf %2 : vector<1x8x32xf32> to vector<1x8x32xbf16>
    %4 = tpu.concatenate %1, %3 in 1 : vector<1x8x32xbf16>, vector<1x8x32xbf16> -> vector<1x16x32xbf16>
    %5 = vector.shape_cast %4 : vector<1x16x32xbf16> to vector<16x32xbf16>
    %6 = vector.shape_cast %1 : vector<1x8x32xbf16> to vector<8x32xbf16>
    %c0_5 = arith.constant 0 : index
    %c0_6 = arith.constant 0 : index
    %7 = vector.load %arg3[%c0_5, %c0_6] : memref<32x32xbf16, #tpu.memory_space<vmem>>, vector<32x32xbf16>
    %cst = arith.constant dense<0.000000e+00> : vector<8x32xf32>
    %8 = tpu.matmul %6, %7, %cst {dimension_numbers = #tpu.dot_dimension_numbers<[1], [0], [0], [1], [0, 0, 1, 1], [], []>} : vector<8x32xbf16>, vector<32x32xbf16>, vector<8x32xf32> -> vector<8x32xf32>
    %c0_7 = arith.constant 0 : index
    %c0_8 = arith.constant 0 : index
    %c0_9 = arith.constant 0 : index
    %9 = vector.load %arg4[%c0_7, %c0_8, %c0_9] : memref<2x32x32xbf16, #tpu.memory_space<vmem>>, vector<1x32x32xbf16>
    %10 = vector.shape_cast %9 : vector<1x32x32xbf16> to vector<32x32xbf16>
    %cst_10 = arith.constant dense<0.000000e+00> : vector<16x32xf32>
    %11 = tpu.matmul %5, %10, %cst_10 {dimension_numbers = #tpu.dot_dimension_numbers<[1], [0], [0], [1], [0, 0, 1, 1], [], []>} : vector<16x32xbf16>, vector<32x32xbf16>, vector<16x32xf32> -> vector<16x32xf32>
    %c1 = arith.constant 1 : index
    %c0_11 = arith.constant 0 : index
    %c0_12 = arith.constant 0 : index
    %12 = vector.load %arg4[%c1, %c0_11, %c0_12] : memref<2x32x32xbf16, #tpu.memory_space<vmem>>, vector<1x32x32xbf16>
    %13 = vector.shape_cast %12 : vector<1x32x32xbf16> to vector<32x32xbf16>
    %cst_13 = arith.constant dense<0.000000e+00> : vector<16x32xf32>
    %14 = tpu.matmul %5, %13, %cst_13 {dimension_numbers = #tpu.dot_dimension_numbers<[1], [0], [0], [1], [0, 0, 1, 1], [], []>} : vector<16x32xbf16>, vector<32x32xbf16>, vector<16x32xf32> -> vector<16x32xf32>
    %15 = arith.truncf %8 : vector<8x32xf32> to vector<8x32xbf16>
    %16 = vector.shape_cast %15 : vector<8x32xbf16> to vector<1x8x4x8xbf16>
    %17 = tpu.transpose %16, [0, 2, 1, 3] : vector<1x8x4x8xbf16> -> vector<1x4x8x8xbf16>
    %18 = vector.shape_cast %17 : vector<1x4x8x8xbf16> to vector<4x8x8xbf16>
    %19 = arith.truncf %11 : vector<16x32xf32> to vector<16x32xbf16>
    %20 = vector.shape_cast %19 : vector<16x32xbf16> to vector<1x16x4x8xbf16>
    %21 = tpu.transpose %20, [0, 2, 1, 3] : vector<1x16x4x8xbf16> -> vector<1x4x16x8xbf16>
    %22 = vector.shape_cast %21 : vector<1x4x16x8xbf16> to vector<4x16x8xbf16>
    %23 = arith.truncf %14 : vector<16x32xf32> to vector<16x32xbf16>
    %24 = vector.shape_cast %23 : vector<16x32xbf16> to vector<1x16x4x8xbf16>
    %25 = tpu.transpose %24, [0, 2, 1, 3] : vector<1x16x4x8xbf16> -> vector<1x4x16x8xbf16>
    %26 = vector.shape_cast %25 : vector<1x4x16x8xbf16> to vector<4x16x8xbf16>
    "tpu.trace_start"() <{level = 10 : i32, message = "gqd,gkd->gqk"}> : () -> ()
    %cst_14 = arith.constant dense<0.000000e+00> : vector<4x8x16xf32>
    %27 = tpu.matmul %18, %22, %cst_14 {dimension_numbers = #tpu.dot_dimension_numbers<[2], [2], [1], [1], [0, 0, 0, 1, 1, 1], [0], [0]>} : vector<4x8x8xbf16>, vector<4x16x8xbf16>, vector<4x8x16xf32> -> vector<4x8x16xf32>
    "tpu.trace_stop"() : () -> ()
    %cst_15 = arith.constant dense<0xFF800000> : vector<4x8xf32>
    %28 = vector.multi_reduction <maximumf>, %27, %cst_15 [2] : vector<4x8x16xf32> to vector<4x8xf32>
    %29 = vector.shape_cast %28 : vector<4x8xf32> to vector<4x8x1xf32>
    %30 = vector.broadcast %29 : vector<4x8x1xf32> to vector<4x8x16xf32>
    %31 = arith.subf %27, %30 : vector<4x8x16xf32>
    %32 = math.exp %31 : vector<4x8x16xf32>
    %cst_16 = arith.constant dense<0.000000e+00> : vector<4x8xf32>
    %33 = vector.multi_reduction <add>, %32, %cst_16 [2] : vector<4x8x16xf32> to vector<4x8xf32>
    %34 = vector.shape_cast %33 : vector<4x8xf32> to vector<4x8x1xf32>
    %35 = arith.truncf %32 : vector<4x8x16xf32> to vector<4x8x16xbf16>
    "tpu.trace_start"() <{level = 10 : i32, message = "gqk,gkd->gqd"}> : () -> ()
    %cst_17 = arith.constant dense<0.000000e+00> : vector<4x8x8xf32>
    %36 = tpu.matmul %35, %26, %cst_17 {dimension_numbers = #tpu.dot_dimension_numbers<[2], [1], [1], [2], [0, 0, 0, 1, 1, 2], [0], [0]>} : vector<4x8x16xbf16>, vector<4x16x8xbf16>, vector<4x8x8xf32> -> vector<4x8x8xf32>
    "tpu.trace_stop"() : () -> ()
    %37 = tpu.reciprocal %34 {approx = true} : vector<4x8x1xf32> -> vector<4x8x1xf32>
    %38 = vector.broadcast %37 : vector<4x8x1xf32> to vector<4x8x8xf32>
    %39 = arith.mulf %36, %38 : vector<4x8x8xf32>
    %40 = vector.shape_cast %39 : vector<4x8x8xf32> to vector<1x4x8x8xf32>
    %41 = tpu.transpose %40, [0, 2, 1, 3] : vector<1x4x8x8xf32> -> vector<1x8x4x8xf32>
    %42 = vector.shape_cast %41 : vector<1x8x4x8xf32> to vector<8x32xf32>
    %43 = vector.shape_cast %0 : vector<1x8x32xf32> to vector<8x32xf32>
    %44 = arith.addf %42, %43 : vector<8x32xf32>
    %45 = arith.truncf %44 : vector<8x32xf32> to vector<8x32xbf16>
    %c0_18 = arith.constant 0 : index
    %c0_19 = arith.constant 0 : index
    %46 = vector.load %arg5[%c0_18, %c0_19] : memref<32x32xbf16, #tpu.memory_space<vmem>>, vector<32x32xbf16>
    %cst_20 = arith.constant dense<0.000000e+00> : vector<8x32xf32>
    %47 = tpu.matmul %45, %46, %cst_20 {dimension_numbers = #tpu.dot_dimension_numbers<[1], [0], [0], [1], [0, 0, 1, 1], [], []>} : vector<8x32xbf16>, vector<32x32xbf16>, vector<8x32xf32> -> vector<8x32xf32>
    %c0_21 = arith.constant 0 : index
    %c0_22 = arith.constant 0 : index
    %48 = vector.load %arg6[%c0_21, %c0_22] : memref<1x32xf32, #tpu.memory_space<vmem>>, vector<1x32xf32>
    %49 = vector.broadcast %48 : vector<1x32xf32> to vector<8x32xf32>
    %50 = arith.addf %47, %49 : vector<8x32xf32>
    %51 = vector.shape_cast %50 : vector<8x32xf32> to vector<1x8x32xf32>
    %c0_23 = arith.constant 0 : index
    %c0_24 = arith.constant 0 : index
    %c0_25 = arith.constant 0 : index
    %52 = vector.load %arg7[%c0_23, %c0_24, %c0_25] : memref<1x8x32xf32, #tpu.memory_space<vmem>>, vector<1x8x32xf32>
    tpu.vector_store %arg7[%c0_23, %c0_24, %c0_25], %51 {strides = array<i32>} : memref<1x8x32xf32, #tpu.memory_space<vmem>>, vector<1x8x32xf32>,
    return
  }
  func.func @transform_0(%arg0: i32) -> (i32, i32, i32) {
    %c0_i32 = arith.constant 0 : i32
    %c0_i32_0 = arith.constant 0 : i32
    %c0_i32_1 = arith.constant 0 : i32
    return %arg0, %c0_i32, %c0_i32_0 : i32, i32, i32
  }
  func.func @transform_1(%arg0: i32) -> (i32, i32, i32) {
    %c0_i32 = arith.constant 0 : i32
    %c0_i32_0 = arith.constant 0 : i32
    %c0_i32_1 = arith.constant 0 : i32
    return %arg0, %c0_i32, %c0_i32_0 : i32, i32, i32
  }
  func.func @transform_2(%arg0: i32) -> (i32, i32) {
    %c0_i32 = arith.constant 0 : i32
    %c0_i32_0 = arith.constant 0 : i32
    %c0_i32_1 = arith.constant 0 : i32
    return %c0_i32, %c0_i32_0 : i32, i32
  }
  func.func @transform_3(%arg0: i32) -> (i32, i32, i32) {
    %c0_i32 = arith.constant 0 : i32
    %c0_i32_0 = arith.constant 0 : i32
    %c0_i32_1 = arith.constant 0 : i32
    %c0_i32_2 = arith.constant 0 : i32
    return %c0_i32, %c0_i32_0, %c0_i32_1 : i32, i32, i32
  }
  func.func @transform_4(%arg0: i32) -> (i32, i32) {
    %c0_i32 = arith.constant 0 : i32
    %c0_i32_0 = arith.constant 0 : i32
    %c0_i32_1 = arith.constant 0 : i32
    return %c0_i32, %c0_i32_0 : i32, i32
  }
  func.func @transform_5(%arg0: i32) -> (i32, i32) {
    %c0_i32 = arith.constant 0 : i32
    %c0_i32_0 = arith.constant 0 : i32
    %c0_i32_1 = arith.constant 0 : i32
    return %c0_i32, %c0_i32_0 : i32, i32
  }
  func.func @transform_6(%arg0: i32) -> (i32, i32, i32) {
    %c0_i32 = arith.constant 0 : i32
    %c0_i32_0 = arith.constant 0 : i32
    %c0_i32_1 = arith.constant 0 : i32
    return %arg0, %c0_i32, %c0_i32_0 : i32, i32, i32
  }
}

</mosaic_0001>

<bundles_post_ra>
// kernel: tpu_custom_call.1
= control target key start
LH: loop header
LB: loop body
LE: loop exit
PB: predicated region body
PF: predicated region fallthrough
CT: control target
= control target key end

     0   :  { %s3074_s0 = inlined_call_operand.hbm [shape: f32[2,8,32], index: 0, kind: input, shape index: {}]   ;;  %s3075_s1 = inlined_call_operand.hbm [shape: f32[2,8,32], index: 1, kind: input, shape index: {}]   ;;  %s3076_s2 = inlined_call_operand.hbm [shape: bf16[32,32], index: 2, kind: input, shape index: {}]   ;;  %s3077_s3 = inlined_call_operand.hbm [shape: bf16[2,32,32], index: 3, kind: input, shape index: {}]   ;;  %s3078_s4 = inlined_call_operand.hbm [shape: bf16[32,32], index: 4, kind: input, shape index: {}]   ;;  %s3079_s5 = inlined_call_operand.vmem [shape: f32[1,32], index: 5, kind: input, shape index: {}]   ;;  %s3080_s6 = inlined_call_operand.hbm [shape: f32[2,8,32], index: 6, kind: output, shape index: {}]  }
   0x1   :  { %3085 = sst [smem:[#allocation17_spill]] %s3076_s2 }
   0x2   :  { %3086 = sst [smem:[#allocation18_spill]] %s3077_s3 }
   0x3   :  { %3087 = sst [smem:[#allocation19_spill]] %s3078_s4 }
   0x4   :  { %11 = vsyncpa [#allocation3], 0 }
   0x5   :  { %13 = vsyncpa [#allocation3 + $0x1], 0 }
   0x6   :  { %14 = vsyncpa [#allocation6], 0 }
   0x7   :  { %16 = vsyncpa [#allocation6 + $0x1], 0 }
   0x8   :  { %17 = vsyncpa [#allocation9], 0 }
   0x9   :  { %18 = vsyncpa [#allocation4], 0 }
   0xa   :  { %20 = vsyncpa [#allocation4 + $0x1], 0  ;;  %s2568_s21 = smov 0   ;;  %s2570_s22 = smov 0  }
   0xb   :  { %s2572_s23 = smov 0   ;;  %s2574_s24 = smov 0  }
   0xc LB: > { %s2589_s25 = sadd.s32 4294967295, %s2512_s24   ;;  %s2011_s26 = sadd.s32 4294967294, %s2512_s24   ;;  %s2512_s24 = sphi %s2574_s24, %s3111_s24   ;;  %s2508_s23 = sphi %s2572_s23, %s3110_s23   ;;  %s2504_s22 = sphi %s2570_s22, %s3109_s22   ;;  %s2500_s21 = sphi %s2568_s21, %s3108_s21  }
   0xd   : > { %p46_p0 = scmp.ne.s32.totalorder %s2504_s22, %s2500_s21  ;;  %p3081_p1 = scmp.eq.s32.totalorder %s2589_s25, 0 }
   0xe   : > { %p186_p3 = scmp.eq.s32.totalorder %s2011_s26, 1  ;;  %p2012_p5 = scmp.ge.s32.totalorder %s2512_s24, 1 }
   0xf   : > { %p2598_p4 = por %p3081_p1, %p46_p0  ;;  %p193_p7 = scmp.lt.s32.totalorder %s2512_s24, 3 }
  0x10   : > { %p2603_p6 = por %p186_p3, %p46_p0  ;;  %s2514_s30 = smov [#allocation7]  }
  0x11   : > { %s3088_s27 = scalar_select %p2598_p4, 1, 0 }
  0x12   : > { %s3089_s28 = scalar_select %p2603_p6, 1, 0 }
  0x13   : > { %p2608_p8 = pnand %p2012_p5, %p193_p7  ;;  %s205_s7 = sshll.u32 %s2514_s30, 4  ;;  %s2612_s7 = int_to_ptr.vmem [resolvable:$true] %s205_s7 }
  0x14   : > { %s2515_s9 = smov [#allocation8]   ;;  %s2516_s11 = smov [#allocation10]  }
  0x15   : > { %s3090_s29 = scalar_select %p2608_p8, 1, 0 }
  0x16   : > { %p2189_p9 = pneg %p2608_p8  ;;  %s218_s10 = sshll.u32 %s2515_s9, 4  ;;  %s2623_s10 = int_to_ptr.vmem [resolvable:$true] %s218_s10 }
  0x17   : > { %s2625_s12 = sshll.u32 %s2516_s11, 4  ;;  %s3092_s2 = sld [smem:[#allocation17_spill]]  ;;  %s232_s12 = int_to_ptr.vmem [resolvable:$true] %s2625_s12 }
  0x18   : > { %p2619_p11 = pnand %p2189_p9, %p3081_p1 }
  0x1a   : > { %p2635_p13 = pneg %p2619_p11 }
  0x1d   : > { %s2290_s15 = scalar_lea.hbm %s3092_s2, 256 }
  0x1e   : > { %p2291_p12 = scmp.ne.s32.totalorder %s3092_s2, %s2290_s15  ;;  %p2297_p5 = scmp.lt.u32.totalorder %s2290_s15, %s3092_s2 }
  0x20   : > { %p2293_p0 = pnand %p2635_p13, %p2291_p12 }
  0x22   : > { %p2294_p3 = pneg %p2293_p0 }
  0x24   : > { %p2299_p7 = pnand %p2297_p5, %p2294_p3 }
  0x26   : > { %2302 = shalt.err (!%p2299_p7)
}
  0x27   : > { %s2303_s26 = scalar_lea.vmem %s2612_s7, 256  ;;  %p2311_p2 = scmp.lt.s32.totalorder %s2612_s7, %s2612_s7 }
  0x28   : > { %p2304_p9 = scmp.ne.s32.totalorder %s2612_s7, %s2303_s26  ;;  %p2312_p6 = scmp.lt.s32.totalorder %s2303_s26, %s2303_s26 }
  0x2a   : > { %p2306_p10 = pnand %p2304_p9, %p2635_p13  ;;  %p2313_p12 = por %p2312_p6, %p2311_p2 }
  0x2c   : > { %p2307_p1 = pneg %p2306_p10 }
  0x2e   : > { %p2314_p0 = pnand %p2313_p12, %p2307_p1 }
  0x30   : > { %2317 = shalt.err (!%p2314_p0)
}
  0x31   : > { %s2517_s30 = smov 64   ;;  %s2518_s9 = smov 4  }
  0x32   : > { %2192 = dma.hbm_to_vmem [thread:$0]  (!%p2619_p11), %s3092_s2, 256, %s2612_s7, [#allocation6], %s2517_s30, %s2517_s30, %s2518_s9  }
  0x33   : > { %s3094_s3 = sld [smem:[#allocation18_spill]] }
  0x39   : > { %s2318_s16 = scalar_lea.hbm %s3094_s3, 512 }
  0x3a   : > { %p2319_p1 = scmp.ne.s32.totalorder %s3094_s3, %s2318_s16  ;;  %p2325_p10 = scmp.lt.u32.totalorder %s2318_s16, %s3094_s3 }
  0x3c   : > { %p2321_p2 = pnand %p2319_p1, %p2635_p13 }
  0x3e   : > { %p2322_p6 = pneg %p2321_p2 }
  0x40   : > { %p2327_p3 = pnand %p2325_p10, %p2322_p6 }
  0x42   : > { %2330 = shalt.err (!%p2327_p3)
}
  0x43   : > { %s2331_s7 = scalar_lea.vmem %s2623_s10, 512  ;;  %p2339_p12 = scmp.lt.s32.totalorder %s2623_s10, %s2623_s10 }
  0x44   : > { %p2332_p5 = scmp.ne.s32.totalorder %s2623_s10, %s2331_s7  ;;  %p2340_p0 = scmp.lt.s32.totalorder %s2331_s7, %s2331_s7 }
  0x46   : > { %p2334_p7 = pnand %p2332_p5, %p2635_p13  ;;  %p2341_p1 = por %p2340_p0, %p2339_p12 }
  0x48   : > { %p2335_p9 = pneg %p2334_p7 }
  0x4a   : > { %p2342_p2 = pnand %p2341_p1, %p2335_p9 }
  0x4c   : > { %2345 = shalt.err (!%p2342_p2)
}
  0x4d   : > { %2195 = dma.hbm_to_vmem [thread:$0]  (!%p2619_p11), %s3094_s3, 512, %s2623_s10, [#allocation9], %s2517_s30, %s2517_s30, %s2518_s9  }
  0x4e   : > { %s3095_s4 = sld [smem:[#allocation19_spill]] }
  0x54   : > { %s2346_s16 = scalar_lea.hbm %s3095_s4, 256 }
  0x55   : > { %p2347_p6 = scmp.ne.s32.totalorder %s3095_s4, %s2346_s16  ;;  %p2353_p5 = scmp.lt.u32.totalorder %s2346_s16, %s3095_s4 }
  0x57   : > { %p2349_p10 = pnand %p2347_p6, %p2635_p13 }
  0x59   : > { %p2350_p3 = pneg %p2349_p10 }
  0x5b   : > { %p2355_p7 = pnand %p2353_p5, %p2350_p3 }
  0x5d   : > { %2358 = shalt.err (!%p2355_p7)
}
  0x5e   : > { %s2359_s7 = scalar_lea.vmem %s232_s12, 256  ;;  %p2367_p1 = scmp.lt.s32.totalorder %s232_s12, %s232_s12 }
  0x5f   : > { %p2360_p9 = scmp.ne.s32.totalorder %s232_s12, %s2359_s7  ;;  %p2368_p2 = scmp.lt.s32.totalorder %s2359_s7, %s2359_s7 }
  0x61   : > { %p2362_p12 = pnand %p2360_p9, %p2635_p13  ;;  %p2369_p4 = por %p2368_p2, %p2367_p1 }
  0x63   : > { %p2363_p0 = pneg %p2362_p12 }
  0x65   : > { %p2370_p8 = pnand %p2369_p4, %p2363_p0 }
  0x67   : > { %2373 = shalt.err (!%p2370_p8)
}
  0x68   : > { %2198 = dma.hbm_to_vmem [thread:$0]  (!%p2619_p11), %s3095_s4, 256, %s232_s12, [#allocation9], %s2517_s30, %s2517_s30, %s2518_s9  }
  0x69   : > { %s2708_s18 = sadd.s32 1, %s2512_s24   ;;  %s33_s13 = sadd.s32 1, %s2508_s23 }
  0x6a   : > { %s30_s8 = ssub.s32 %s2512_s24, %s2708_s18  ;;  %p40_p8 = scmp.ne.s32.totalorder %s2508_s23, %s2504_s22 }
  0x6b   : > { %p31_p4 = scmp.eq.s32.totalorder %s30_s8, 0  ;;  %p41_p13 = scmp.eq.s32.totalorder %s2512_s24, 0 }
  0x6c   : > { %p2213_p6 = scmp.lt.s32.totalorder %s2512_s24, 2  ;;  %p3096_p3 = scmp.eq.s32.totalorder %s2589_s25, 1 }
  0x6d   : > { %s2718_s14 = scalar_select %p31_p4, %s2508_s23, %s33_s13  }
  0x6e   : > { %p42_p10 = por %p41_p13, %p40_p8  ;;  %p2722_p5 = por %p3096_p3, %p40_p8 }
  0x6f   : > { %s248_s16 = sand.u32 1, %s2508_s23   ;;  %s2018_s17 = sshll.u32 %s2512_s24, 7 }
  0x70   : > { %s3097_s15 = scalar_select %p2722_p5, 1, 0 }
  0x71   : > { %s2728_s12 = sshll.u32 %s248_s16, 3  ;;  %s2733_s19 = scalar_lea.hbm %s3074_s0, %s2018_s17 }
  0x72   : > { %s252_s20 = scalar_lea.vmem [#allocation2], %s2728_s12  ;;  %p2736_p11 = pnand %p2213_p6, %p42_p10 }
  0x73   : > { %s259_s26 = sshll.u32 %s252_s20, 4  ;;  %s2745_s8 = scalar_lea.hbm %s3075_s1, %s2018_s17  ;;  %s2740_s26 = int_to_ptr.vmem [resolvable:$true] %s259_s26 }
  0x74   : > { %s249_s13 = scalar_lea.sflag [#allocation3], %s248_s16  ;;  %s2374_s30 = scalar_lea.hbm %s2733_s19, 128 }
  0x75   : > { %p2375_p7 = scmp.ne.s32.totalorder %s2733_s19, %s2374_s30  ;;  %p2376_p9 = pneg %p2736_p11 }
  0x76   : > { %s2379_s2 = scalar_lea.hbm %s3074_s0, 256  ;;  %p2380_p1 = scmp.lt.u32.totalorder %s2733_s19, %s3074_s0 }
  0x77   : > { %p2377_p12 = pnand %p2376_p9, %p2375_p7  ;;  %p2381_p2 = scmp.lt.u32.totalorder %s2379_s2, %s2374_s30 }
  0x78   : > { %p2383_p8 = scmp.lt.u32.totalorder %s2374_s30, %s2733_s19 }
  0x79   : > { %p2378_p0 = pneg %p2377_p12  ;;  %p2382_p4 = por %p2381_p2, %p2380_p1 }
  0x7b   : > { %p2384_p13 = por %p2383_p8, %p2382_p4 }
  0x7d   : > { %p2385_p6 = pnand %p2384_p13, %p2378_p0 }
  0x7f   : > { %2388 = shalt.err (!%p2385_p6)
}
  0x80   : > { %s2389_s16 = scalar_lea.vmem %s2740_s26, 128  ;;  %s2519_s17 = smov [#allocation2]  }
  0x81   : > { %p2390_p10 = scmp.ne.s32.totalorder %s2740_s26, %s2389_s16  ;;  %s2394_s10 = sshll.u32 %s2519_s17, 4  ;;  %s2395_s10 = int_to_ptr.vmem [resolvable:$false] %s2394_s10 }
  0x82   : > { %s2396_s3 = scalar_lea.vmem %s2395_s10, 256  ;;  %p2397_p12 = scmp.lt.s32.totalorder %s2740_s26, %s2395_s10 }
  0x83   : > { %p2392_p3 = pnand %p2390_p10, %p2376_p9  ;;  %p2398_p1 = scmp.lt.s32.totalorder %s2396_s3, %s2389_s16 }
  0x85   : > { %p2393_p7 = pneg %p2392_p3  ;;  %p2399_p2 = por %p2398_p1, %p2397_p12 }
  0x87   : > { %p2400_p4 = pnand %p2399_p2, %p2393_p7 }
  0x89   : > { %2403 = shalt.err (!%p2400_p4)
}
  0x8a   : > { %2202 = dma.hbm_to_vmem [thread:$0]  (!%p2736_p11), %s2733_s19, 128, %s2740_s26, %s249_s13  }
  0x8b   : > { %s266_s2 = sand.u32 1, %s2512_s24   ;;  %s270_s4 = scalar_lea.vmem [#allocation5], %s2728_s12 }
  0x8c   : > { %s277_s11 = sshll.u32 %s270_s4, 4  ;;  %s267_s30 = scalar_lea.sflag [#allocation6], %s266_s2  ;;  %s278_s11 = int_to_ptr.vmem [resolvable:$true] %s277_s11 }
  0x8d   : > { %s2404_s9 = scalar_lea.hbm %s2745_s8, 128  ;;  %s2409_s17 = scalar_lea.hbm %s3075_s1, 256 }
  0x8e   : > { %p2405_p0 = scmp.ne.s32.totalorder %s2745_s8, %s2404_s9  ;;  %p2410_p6 = scmp.lt.u32.totalorder %s2745_s8, %s3075_s1 }
  0x8f   : > { %p2411_p10 = scmp.lt.u32.totalorder %s2409_s17, %s2404_s9  ;;  %p2413_p7 = scmp.lt.u32.totalorder %s2404_s9, %s2745_s8 }
  0x90   : > { %p2407_p8 = pnand %p2405_p0, %p2376_p9 }
  0x91   : > { %p2412_p3 = por %p2411_p10, %p2410_p6 }
  0x92   : > { %p2408_p13 = pneg %p2407_p8 }
  0x93   : > { %p2414_p12 = por %p2413_p7, %p2412_p3 }
  0x95   : > { %p2415_p1 = pnand %p2414_p12, %p2408_p13 }
  0x97   : > { %2418 = shalt.err (!%p2415_p1)
}
  0x98   : > { %s2419_s12 = scalar_lea.vmem %s278_s11, 128  ;;  %s2520_s19 = smov [#allocation5]  }
  0x99   : > { %p2420_p2 = scmp.ne.s32.totalorder %s278_s11, %s2419_s12  ;;  %s2424_s26 = sshll.u32 %s2520_s19, 4  ;;  %s2425_s26 = int_to_ptr.vmem [resolvable:$false] %s2424_s26 }
  0x9a   : > { %s2426_s13 = scalar_lea.vmem %s2425_s26, 256  ;;  %p2427_p8 = scmp.lt.s32.totalorder %s278_s11, %s2425_s26 }
  0x9b   : > { %p2422_p4 = pnand %p2420_p2, %p2376_p9  ;;  %p2428_p5 = scmp.lt.s32.totalorder %s2426_s13, %s2419_s12 }
  0x9d   : > { %p2423_p0 = pneg %p2422_p4  ;;  %p2429_p6 = por %p2428_p5, %p2427_p8 }
  0x9f   : > { %p2430_p10 = pnand %p2429_p6, %p2423_p0 }
  0xa1   : > { %2433 = shalt.err (!%p2430_p10)
}
  0xa2   : > { %2205 = dma.hbm_to_vmem [thread:$0]  (!%p2736_p11), %s2745_s8, 128, %s278_s11, %s267_s30  }
  0xa3   : > { %p3099_p13 = scmp.ne.s32.totalorder %s3090_s29, 0 }
  0xa4   : > { %s2796_s2 = sand.u32 (!%p3099_p13), 1, %s2504_s22   ;;  %p3100_p5 = scmp.ne.s32.totalorder (!%p3099_p13), %s3088_s27, 0 }
  0xa5   : > { %286 = sbr.rel (%p3099_p13) target bundleno = 1578 (0x62a), region = 44  ;;  %s2799_s4 = sshll.u32 (!%p3099_p13), %s2796_s2, 3 }
  0xa6   : > { %s289_s9 = scalar_lea.sflag (!%p3099_p13), [#allocation3], %s2796_s2  ;;  %s292_s20 = scalar_lea.vmem (!%p3099_p13), [#allocation2], %s2799_s4 }
  0xac   : > { %2479 = dma.done.wait (%p3100_p5), %s289_s9, 128  }
  0xad   : > { %2481 = vsyncadd (%p3100_p5), %s289_s9, 4294967168  ;;  %s297_s29 = sand.u32 1, %s2589_s25   ;;  %s301_s8 = scalar_lea.vmem [#allocation5], %s2799_s4 }
  0xae   : > { %s298_s7 = scalar_lea.sflag [#allocation6], %s297_s29 }
  0xaf   : > { %2483 = dma.done.wait (%p3100_p5), %s298_s7, 128  }
  0xb0   : > { %2485 = vsyncadd (%p3100_p5), %s298_s7, 4294967168  ;;  %p3101_p11 = scmp.eq.s32.totalorder %s2589_s25, 0 }
  0xb2   : > { %2487 = dma.done.wait (%p3101_p11), [#allocation6], 256   ;;  %p3102_p9 = pmov %p3101_p11 }
  0xb4   : > { %2489 = vsyncadd (%p3102_p9), [#allocation6], 4294967040  ;;  %p3103_p3 = pmov %p3102_p9 }
  0xb6   : > { %2491 = dma.done.wait (%p3103_p3), [#allocation9], 768   ;;  %p3104_p7 = pmov %p3103_p3 }
  0xb7   : > { %v2521_v0 = vmov 0.0   ;;  %vm2522_vm0 = vmmov 0   ;;  %v2266_v1 = vld [vmem:[#allocation8] sm:$0xff]   ;;  %v2267_v2 = vld [vmem:[#allocation8 + $0x8] sm:$0xff]   ;;  %v2268_v3 = vld [vmem:[#allocation7] sm:$0xff]   ;;  %vm354_vm1 = vcmask 1043456   ;;  %v545_v30 = vlaneseq }
  0xb8   : > { %2493 = vsyncadd (%p3104_p7), [#allocation9], 4294966528  ;;  %2099 = vmatprep.subr.bf16.mxu1 %v2521_v0  ;;  %2091 = vmatprep.subr.bf16.mxu0 %v2521_v0  ;;  %v2828_v4 = vld [vmem:[%s292_s20] sm:$0xff]  ;;  %v350_v5 = vld [vmem:[%s301_s8] sm:$0xff]  ;;  %vm374_vm2 = vcmask 261120   ;;  %s2523_s27 = smov 104  }
  0xb9   : > { %2103 = vmatprep.mubr.msk.bf16.mxu1 %vm2522_vm0, %v2521_v0  ;;  %2095 = vmatprep.mubr.msk.bf16.mxu0 %vm2522_vm0, %v2521_v0  ;;  %v349_v6 = vpack.c.bf16 %v2828_v4, %v2828_v4  ;;  %v351_v7 = vpack.c.bf16 %v350_v5, %v350_v5  ;;  %v2269_v8 = vld [vmem:[#allocation7 + $0x8] sm:$0xff]   ;;  %v2270_v11 = vld [vmem:[#allocation8 + $0x10] sm:$0xff]   ;;  %s2524_s11 = smov 120   ;;  %s2525_s30 = smov 112   ;;  %v2526_v28 = vmov 1983009808  }
  0xba   : > { %2100 = vmatpush3.bf16.msra.mxu1 %v2266_v1  ;;  %2092 = vmatpush3.bf16.msra.mxu0 %v2268_v3  ;;  %v2271_v12 = vld [vmem:[#allocation8 + $0x18] sm:$0xff]   ;;  %v543_v29 = vunpack.c.l.s4 %v2526_v28  ;;  %v546_v32 = vshrl.u32 %v545_v30, 7  ;;  %v2527_v33 = vmov 1934713408   ;;  %v2528_v36 = vmov 0   ;;  %s2529_s16 = smov 16  }
  0xbb   : > { %2101 = vmatprep.subr.bf16.mxu1 %v2521_v0  ;;  %2093 = vmatprep.subr.bf16.mxu0 %v2521_v0  ;;  %v353_v9 = vrot.slane %v351_v7, 4  ;;  %v560_v34 = vunpack.c.l.s4 %v2527_v33  ;;  %v2855_v37 = vpack.i.b16 %v2528_v36, %v2528_v36  ;;  %vm1249_vm3 = vcmask 64512   ;;  %s2530_s17 = smov 8   ;;  %s2531_s10 = smov 24  }
  0xbc   : > { %v544_v31 = vunpack.c.0.s8 %v543_v29  ;;  %vm1434_vm4 = vcmask 130048   ;;  %vm1805_vm5 = vcmask 195584   ;;  %s2060_s19 = sshll.u32 %s2589_s25, 7  ;;  %s346_s26 = scalar_lea.vmem [#allocation11], %s2799_s4 }
  0xbd   : > { %v357_v10 = vsel %vm354_vm1, %v349_v6, %v353_v9  ;;  %v561_v44 = vunpack.c.0.s8 %v560_v34  ;;  %s1890_s13 = sshll.u32 %s346_s26, 4  ;;  %s3029_s29 = scalar_lea.hbm %s3080_s6, %s2060_s19  ;;  %s3031_s13 = int_to_ptr.vmem [resolvable:$true] %s1890_s13 }
  0xbe   : > { %2102 = vmatpush3.bf16.msra.mxu1 %v2267_v2  ;;  %2094 = vmatpush3.bf16.msra.mxu0 %v2269_v8  ;;  %v2857_v42 = vsub.s32 %v544_v31, %v546_v32  ;;  %s1877_s25 = scalar_lea.sflag [#allocation4], %s2796_s2  ;;  %s2434_s4 = scalar_lea.vmem %s3031_s13, 128 }
  0xbf   : > { %2115 = vmatprep.subr.bf16.mxu1 %v2521_v0  ;;  %2107 = vmatprep.subr.bf16.mxu0 %v2521_v0  ;;  %v2863_v54 = vsub.s32 %v561_v44, %v546_v32  ;;  %p2435_p12 = scmp.ne.s32.totalorder %s3031_s13, %s2434_s4  ;;  %p3105_p1 = scmp.ne.s32.totalorder %s3097_s15, 0 }
  0xc0   : > { %s2532_s7 = smov [#allocation11]  }
  0xc1   : > { %2104 = vmatmul.mubr.msk.bf16.vlgmr.msra.gmra.mrb[0].mxu1 %vm374_vm2, %v357_v10  ;;  %2096 = vmatmul.mubr.msk.bf16.vlgmr.msra.gmra.mrb[0].mxu0 %vm374_vm2, %v349_v6  ;;  %p2436_p2 = pnand %p2435_p12, %p3105_p1  ;;  %s2438_s8 = sshll.u32 %s2532_s7, 4  ;;  %s2439_s8 = int_to_ptr.vmem [resolvable:$false] %s2438_s8 }
  0xc2   : > { %2117 = vmatprep.mubr.msk.bf16.mxu1 %vm2522_vm0, %v2521_v0  ;;  %2111 = vmatprep.mubr.msk.bf16.mxu0 %vm2522_vm0, %v2521_v0  ;;  %p2441_p0 = scmp.lt.s32.totalorder %s3031_s13, %s2439_s8 }
  0xc3   : > { %2108 = vmatpush3.bf16.msra.mxu0 %v2270_v11  ;;  %p2437_p4 = pneg %p2436_p2 }
  0xc4   : > { %2109 = vmatprep.subr.bf16.mxu0 %v2521_v0 }
  0xc7   : > { %2110 = vmatpush3.bf16.msra.mxu0 %v2271_v12 }
  0xc8   : > { %2121 = vmatprep.subr.bf16.mxu0 %v2521_v0 }
  0xca   : > { %2112 = vmatmul.mubr.msk.bf16.vlgmr.msra.gmra.mrb[4].mxu0 %vm374_vm2, %v357_v10 }
  0xcb   : > { %2123 = vmatprep.mubr.msk.bf16.mxu0 %vm2522_vm0, %v2521_v0 }
 0x194   : > { %v469_v13 = vpop.f32.mrb[0].mxu1  ;;  %v411_v16 = vpop.f32.mrb[0].mxu0 }
 0x195   : > { %v2105_v14 = vpop.f32.mrb[1].mxu1  ;;  %v2097_v19 = vpop.f32.mrb[1].mxu0  ;;  %v534_v21 = vpack.c.bf16 %v411_v16, %v411_v16 }
 0x196   : > { %v472_v15 = vpop.f32.mrb[2].mxu1  ;;  %v414_v20 = vpop.f32.mrb[2].mxu0 }
 0x197   : > { %v703_v17 = vpack.c.bf16 %v472_v15, %v469_v13  ;;  %v2106_v18 = vpop.f32.mrb[3].mxu1  ;;  %v2098_v22 = vpop.f32.mrb[3].mxu0  ;;  %v548_v55 = vrot.slane %v534_v21, %v2857_v42 }
 0x199   : > { %709 = vrot.lane.b32.xlu1 %v703_v17, %s2523_s27  ;;  %705 = vrot.lane.b32.xlu0 %v703_v17, %s2524_s11  ;;  %v715_v40 = vshrl.u32 %v703_v17, 16 }
 0x19d   : > { %536 = vrot.lane.b32.xlu1 %v534_v21, %s2524_s11  ;;  %707 = vrot.lane.b32.xlu0 %v703_v17, %s2525_s30  ;;  %v527_v23 = vpop.f32.mrb[4].mxu0 }
 0x19e   : > { %v2113_v24 = vpop.f32.mrb[5].mxu0 }
 0x19f   : > { %v530_v25 = vpop.f32.mrb[6].mxu0 }
 0x1a0   : > { %v2850_v26 = vpack.c.bf16 %v530_v25, %v527_v23  ;;  %v2114_v27 = vpop.f32.mrb[7].mxu0 }
 0x1a1   : > { %540 = vrot.lane.b32.xlu1 %v534_v21, %s2523_s27  ;;  %538 = vrot.lane.b32.xlu0 %v534_v21, %s2525_s30 }
 0x1a5   : > { %979 = vrot.lane.b32.xlu0 %v2850_v26, %s2524_s11 }
 0x20b   : > { %v710_v35 = vpop.permute.xlu1 %709  ;;  %v706_v38 = vpop.permute.xlu0 %705 }
 0x20c   : > { %v713_v39 = vpack.i.b16 %v706_v38, %v703_v17  ;;  %v716_v41 = vshrl.u32 %v706_v38, 16  ;;  %v724_v49 = vshrl.u32 %v710_v35, 16 }
 0x20e   : > { %v717_v43 = vpack.i.b16 %v716_v41, %v715_v40  ;;  %v733_v45 = vcombine.high %v713_v39, %v2855_v37  ;;  %v740_v52 = vrot.slane %v713_v39, %v2857_v42 }
 0x20f   : > { %v537_v46 = vpop.permute.xlu1 %536  ;;  %v708_v47 = vpop.permute.xlu0 %707 }
 0x210   : > { %v799_v48 = vcombine.high %v717_v43, %v2855_v37  ;;  %v721_v50 = vpack.i.b16 %v710_v35, %v708_v47  ;;  %v723_v51 = vshrl.u32 %v708_v47, 16  ;;  %v582_v53 = vrot.slane %v537_v46, %v2857_v42 }
 0x211   : > { %v747_v56 = vrot.slane %v733_v45, %v2857_v42  ;;  %v806_v62 = vrot.slane %v717_v43, %v2857_v42 }
 0x212   : > { %v725_v57 = vpack.i.b16 %v724_v49, %v723_v51  ;;  %v748_v58 = vcombine.high %v721_v50, %v2855_v37  ;;  %v755_v59 = vrot.slane %v721_v50, %v2857_v42  ;;  %v813_v63 = vrot.slane %v799_v48, %v2857_v42 }
 0x213   : > { %v541_v60 = vpop.permute.xlu1 %540  ;;  %v539_v61 = vpop.permute.xlu0 %538 }
 0x214   : > { %v590_v1 = vrot.slane %v541_v60, %v2857_v42  ;;  %v556_v2 = vrot.slane %v539_v61, %v2857_v42  ;;  %v762_v3 = vrot.slane %v748_v58, %v2857_v42  ;;  %v763_v5 = vcombine.low %v740_v52, %v755_v59 }
 0x215   : > { %v764_v6 = vcombine.high %v740_v52, %v755_v59  ;;  %v814_v7 = vcombine.high %v725_v57, %v2855_v37  ;;  %v821_v8 = vrot.slane %v725_v57, %v2857_v42 }
 0x216   : > { %v591_v9 = vcombine.low %v582_v53, %v590_v1  ;;  %v592_v10 = vcombine.high %v582_v53, %v590_v1  ;;  %v557_v11 = vcombine.low %v548_v55, %v556_v2  ;;  %v771_v12 = vrot.slane %v763_v5, %v2863_v54 }
 0x217   : > { %v778_v13 = vrot.slane %v764_v6, %v2863_v54  ;;  %v779_v14 = vcombine.low %v747_v56, %v762_v3  ;;  %v780_v15 = vcombine.high %v747_v56, %v762_v3  ;;  %v828_v16 = vrot.slane %v814_v7, %v2857_v42 }
 0x218   : > { %v829_v17 = vcombine.low %v806_v62, %v821_v8  ;;  %v830_v18 = vcombine.high %v806_v62, %v821_v8  ;;  %v599_v19 = vrot.slane %v591_v9, %v2863_v54  ;;  %v606_v38 = vrot.slane %v592_v10, %v2863_v54 }
 0x219   : > { %v787_v20 = vrot.slane %v779_v14, %v2863_v54  ;;  %v794_v21 = vrot.slane %v780_v15, %v2863_v54  ;;  %v865_v22 = vcombine.low %v771_v12, %v778_v13  ;;  %v2037_v23 = vcombine.high %v771_v12, %v778_v13 }
 0x21a   : > { %v837_v24 = vrot.slane %v829_v17, %v2863_v54  ;;  %v844_v25 = vrot.slane %v830_v18, %v2863_v54  ;;  %v845_v27 = vcombine.low %v813_v63, %v828_v16  ;;  %v846_v28 = vcombine.high %v813_v63, %v828_v16 }
 0x21b   : > { %v872_v29 = vrot.slane %v865_v22, %v2857_v42  ;;  %v881_v30 = vcombine.low %v787_v20, %v794_v21  ;;  %v880_v33 = vrot.slane %v2037_v23, %v2857_v42  ;;  %v2038_v34 = vcombine.high %v787_v20, %v794_v21 }
 0x21c   : > { %v853_v31 = vrot.slane %v845_v27, %v2863_v54  ;;  %v860_v32 = vrot.slane %v846_v28, %v2863_v54  ;;  %v915_v35 = vcombine.low %v837_v24, %v844_v25  ;;  %v607_v39 = vcombine.high %v599_v19, %v2528_v36 }
 0x21d   : > { %v558_v40 = vcombine.high %v548_v55, %v556_v2  ;;  %v2039_v41 = vcombine.high %v837_v24, %v844_v25  ;;  %v614_v44 = vshrl.u32 %v599_v19, 16  ;;  %v565_v45 = vrot.slane %v557_v11, %v2863_v54 }
 0x21e   : > { %v931_v43 = vcombine.low %v853_v31, %v860_v32  ;;  %v608_v46 = vcombine.high %v606_v38, %v2528_v36  ;;  %v630_v47 = vshrl.u32 %v606_v38, 16  ;;  %v888_v49 = vrot.slane %v881_v30, %v2857_v42 }
 0x21f   : > { %v572_v48 = vrot.slane %v558_v40, %v2863_v54  ;;  %v622_v50 = vshrl.u32 %v607_v39, 16  ;;  %v573_v51 = vcombine.high %v565_v45, %v2528_v36  ;;  %v613_v52 = vshrl.u32 %v565_v45, 16 }
 0x220   : > { %v896_v53 = vrot.slane %v2038_v34, %v2857_v42  ;;  %v2040_v56 = vcombine.high %v853_v31, %v860_v32  ;;  %v638_v55 = vshrl.u32 %v608_v46, 16  ;;  %v611_v59 = vpack.i.b16 %v599_v19, %v565_v45 }
 0x221   : > { %v574_v57 = vcombine.high %v572_v48, %v2528_v36  ;;  %v629_v58 = vshrl.u32 %v572_v48, 16  ;;  %v615_v60 = vpack.i.b16 %v614_v44, %v613_v52  ;;  %v619_v61 = vpack.i.b16 %v607_v39, %v573_v51 }
 0x222   : > { %v621_v62 = vshrl.u32 %v573_v51, 16  ;;  %v627_v63 = vpack.i.b16 %v606_v38, %v572_v48  ;;  %v897_v6 = vcombine.low %v872_v29, %v880_v33  ;;  %v905_v7 = vcombine.low %v888_v49, %v896_v53 }
 0x223   : > { %v631_v1 = vpack.i.b16 %v630_v47, %v629_v58  ;;  %v635_v2 = vpack.i.b16 %v608_v46, %v574_v57  ;;  %v637_v3 = vshrl.u32 %v574_v57, 16  ;;  %v922_v8 = vrot.slane %v915_v35, %v2857_v42 }
 0x224   : > { %v623_v5 = vpack.i.b16 %v622_v50, %v621_v62  ;;  %v912_v12 = vrot.slane %v905_v7, %v2863_v54  ;;  %v930_v13 = vrot.slane %v2039_v41, %v2857_v42  ;;  %v938_v14 = vrot.slane %v931_v43, %v2857_v42 }
 0x225   : > { %v639_v9 = vpack.i.b16 %v638_v55, %v637_v3  ;;  %v649_v10 = vcombine.low %v619_v61, %v635_v2  ;;  %v666_v11 = vcombine.low %v615_v60, %v631_v1  ;;  %v946_v15 = vrot.slane %v2040_v56, %v2857_v42 }
 0x226   : > { %v641_v16 = vcombine.low %v611_v59, %v627_v63  ;;  %v904_v18 = vrot.slane %v897_v6, %v2863_v54  ;;  %v947_v19 = vcombine.low %v922_v8, %v930_v13 }
 0x227   : > { %v674_v17 = vcombine.low %v623_v5, %v639_v9  ;;  %v955_v20 = vcombine.low %v938_v14, %v946_v15  ;;  %v656_v21 = vrot.slane %v649_v10, %v2857_v42  ;;  %v673_v23 = vrot.slane %v666_v11, %v2857_v42 }
 0x228   : > { %v913_v24 = vcombine.low %v904_v18, %v912_v12  ;;  %v954_v25 = vrot.slane %v947_v19, %v2863_v54  ;;  %v648_v28 = vrot.slane %v641_v16, %v2857_v42  ;;  %v914_v41 = vcombine.high %v904_v18, %v912_v12  ;;  %v980_v19 = vpop.permute.xlu0 %979 }
 0x229   : > { %v681_v22 = vrot.slane %v674_v17, %v2857_v42  ;;  %v962_v27 = vrot.slane %v955_v20, %v2863_v54 }
 0x22a   : > { %v657_v31 = vcombine.low %v648_v28, %v656_v21  ;;  %v968_v33 = vshrl.u32 %v913_v24, 16  ;;  %v974_v48 = vshrl.u32 %v914_v41, 16 }
 0x22b   : > { %v682_v29 = vcombine.low %v673_v23, %v681_v22  ;;  %v963_v30 = vcombine.low %v954_v25, %v962_v27  ;;  %v964_v35 = vcombine.high %v954_v25, %v962_v27  ;;  %v989_v22 = vshrl.u32 %v2850_v26, 16 }
 0x22c   : > { %v664_v44 = vrot.slane %v657_v31, %v2863_v54  ;;  %v987_v23 = vpack.i.b16 %v980_v19, %v2850_v26 }
 0x22d   : > { %v967_v32 = vpack.i.b16 %v963_v30, %v913_v24  ;;  %v969_v34 = vshrl.u32 %v963_v30, 16  ;;  %v689_v40 = vrot.slane %v682_v29, %v2863_v54  ;;  %v975_v45 = vshrl.u32 %v964_v35, 16 }
 0x22e   : > { %v973_v46 = vpack.i.b16 %v964_v35, %v914_v41  ;;  %v694_v50 = vshrl.u32 %v664_v44, 16  ;;  %v665_v57 = vcombine.high %v664_v44, %v2528_v36  ;;  %v990_v24 = vshrl.u32 %v980_v19, 16 }
 0x22f   : > { %v1254_v38 = vsel %vm1249_vm3, %v967_v32, 0  ;;  %v970_v39 = vpack.i.b16 %v969_v34, %v968_v33  ;;  %v695_v47 = vshrl.u32 %v689_v40, 16  ;;  %v693_v49 = vpack.i.b16 %v689_v40, %v664_v44 }
 0x230   : > { %2116 = vmatpush3.bf16.xpose.msra.mxu1 %v1254_v38  ;;  %v976_v51 = vpack.i.b16 %v975_v45, %v974_v48  ;;  %v1346_v52 = vsel %vm1249_vm3, %v973_v46, 0  ;;  %v690_v56 = vcombine.high %v689_v40, %v2528_v36  ;;  %v700_v60 = vshrl.u32 %v665_v57, 16 }
 0x231   : > { %v1300_v43 = vsel %vm1249_vm3, %v970_v39, 0  ;;  %2127 = vmatprep.subr.bf16.mxu1 %v2521_v0  ;;  %v696_v53 = vpack.i.b16 %v695_v47, %v694_v50  ;;  %v991_v31 = vpack.i.b16 %v990_v24, %v989_v22  ;;  %v1001_v32 = vcombine.high %v987_v23, %v2855_v37 }
 0x232   : > { %2122 = vmatpush3.bf16.xpose.msra.mxu0 %v1300_v43  ;;  %v1392_v55 = vsel %vm1249_vm3, %v976_v51, 0  ;;  %v701_v58 = vshrl.u32 %v690_v56, 16  ;;  %v699_v59 = vpack.i.b16 %v690_v56, %v665_v57  ;;  %v1008_v39 = vrot.slane %v987_v23, %v2857_v42 }
 0x233   : > { %2133 = vmatprep.subr.bf16.mxu0 %v2521_v0  ;;  %v1015_v43 = vrot.slane %v1001_v32, %v2857_v42  ;;  %v1067_v44 = vcombine.high %v991_v31, %v2855_v37 }
 0x234   : > { %v702_v61 = vpack.i.b16 %v701_v58, %v700_v60 }
 0x237   : > { %2118 = vmatmul.mubr.msk.bf16.vlgmr.msra.gmra.mrb[4].mxu1 %vm1249_vm3, %v693_v49  ;;  %v1074_v49 = vrot.slane %v991_v31, %v2857_v42 }
 0x238   : > { %2128 = vmatpush3.bf16.xpose.msra.mxu1 %v1346_v52  ;;  %2129 = vmatprep.mubr.msk.bf16.mxu1 %vm2522_vm0, %v2521_v0 }
 0x239   : > { %2124 = vmatmul.mubr.msk.bf16.vlgmr.msra.gmra.mrb[8].mxu0 %vm1249_vm3, %v696_v53  ;;  %2139 = vmatprep.subr.bf16.mxu1 %v2521_v0 }
 0x23a   : > { %2134 = vmatpush3.bf16.xpose.msra.mxu0 %v1392_v55  ;;  %2135 = vmatprep.mubr.msk.bf16.mxu0 %vm2522_vm0, %v2521_v0  ;;  %v1081_v55 = vrot.slane %v1067_v44, %v2857_v42 }
 0x23b   : > { %2145 = vmatprep.subr.bf16.mxu0 %v2521_v0 }
 0x23f   : > { %2130 = vmatmul.mubr.msk.bf16.vlgmr.msra.gmra.mrb[8].mxu1 %vm1249_vm3, %v699_v59 }
 0x240   : > { %2141 = vmatprep.mubr.msk.bf16.mxu1 %vm2522_vm0, %v2521_v0 }
 0x241   : > { %2136 = vmatmul.mubr.msk.bf16.vlgmr.msra.gmra.mrb[12].mxu0 %vm1249_vm3, %v702_v61 }
 0x242   : > { %2147 = vmatprep.mubr.msk.bf16.mxu0 %vm2522_vm0, %v2521_v0 }
 0x30a   : > { %v1290_v36 = vpop.f32.mrb[4].mxu1 }
 0x30b   : > { %v2119_v62 = vpop.f32.mrb[5].mxu1  ;;  %v1435_v63 = vsel %vm1434_vm4, %v1290_v36, -inf }
 0x30c   : > { %v1336_v1 = vpop.f32.mrb[8].mxu0  ;;  %1436 = vmax.xlane.f32.xlu0 %v1435_v63  ;;  %v1293_v2 = vpop.f32.mrb[6].mxu1 }
 0x30d   : > { %v2120_v3 = vpop.f32.mrb[7].mxu1  ;;  %v2125_v5 = vpop.f32.mrb[9].mxu0  ;;  %v1438_v6 = vsel %vm1434_vm4, %v1336_v1, -inf }
 0x30e   : > { %1439 = vmax.xlane.f32.xlu1 %v1438_v6  ;;  %v1339_v7 = vpop.f32.mrb[10].mxu0 }
 0x30f   : > { %v2126_v8 = vpop.f32.mrb[11].mxu0 }
 0x312   : > { %v2935_v9 = vpop.f32.mrb[8].mxu1 }
 0x313   : > { %v2131_v10 = vpop.f32.mrb[9].mxu1  ;;  %v1441_v18 = vsel %vm1434_vm4, %v2935_v9, -inf }
 0x314   : > { %v1385_v11 = vpop.f32.mrb[10].mxu1  ;;  %v2937_v12 = vpop.f32.mrb[12].mxu0 }
 0x315   : > { %v2132_v13 = vpop.f32.mrb[11].mxu1  ;;  %v2137_v14 = vpop.f32.mrb[13].mxu0  ;;  %v1444_v17 = vsel %vm1434_vm4, %v2937_v12, -inf }
 0x316   : > { %v1431_v15 = vpop.f32.mrb[14].mxu0 }
 0x317   : > { %v2138_v16 = vpop.f32.mrb[15].mxu0 }
 0x31f   : > { %981 = vrot.lane.b32.xlu1 %v2850_v26, %s2525_s30 }
 0x322   : > { %983 = vrot.lane.b32.xlu0 %v2850_v26, %s2523_s27  ;;  %s2440_s27 = scalar_lea.vmem %s2439_s8, 256 }
 0x323   : > { %p2442_p8 = scmp.lt.s32.totalorder %s2440_s27, %s2434_s4 }
 0x325   : > { %p2443_p6 = por %p2442_p8, %p2441_p0 }
 0x327   : > { %p2444_p10 = pnand %p2443_p6, %p2437_p4 }
 0x341   : > { %1445 = vmax.xlane.f32.xlu0 %v1444_v17 }
 0x343   : > { %1442 = vmax.xlane.f32.xlu1 %v1441_v18 }
 0x399   : > { %v1437_v20 = vpop.xlane.xlu0 %1436 }
 0x39a   : > { %v1447_v21 = vsub.f32 %v1290_v36, %v1437_v20 }
 0x39b   : > { %v1440_v25 = vpop.xlane.xlu1 %1439 }
 0x39c   : > { %v1451_v27 = vmul.f32 1.442695, %v1447_v21  ;;  %v1448_v28 = vsub.f32 %v1336_v1, %v1440_v25 }
 0x39d   : > { %v984_v29 = vpop.permute.xlu0 %983 }
 0x39e   : > { %v1453_v30 = vmul.f32 1.442695, %v1448_v28  ;;  %2274 = vpow2.f32 %v1451_v27  ;;  %v998_v34 = vshrl.u32 %v984_v29, 16 }
 0x39f   : > { %v982_v33 = vpop.permute.xlu1 %981 }
 0x3a0   : > { %2276 = vpow2.f32 %v1453_v30  ;;  %v995_v35 = vpack.i.b16 %v984_v29, %v982_v33  ;;  %v997_v38 = vshrl.u32 %v982_v33, 16 }
 0x3a2   : > { %v999_v40 = vpack.i.b16 %v998_v34, %v997_v38  ;;  %v1016_v26 = vcombine.high %v995_v35, %v2855_v37  ;;  %v1023_v41 = vrot.slane %v995_v35, %v2857_v42 }
 0x3a4   : > { %v1030_v45 = vrot.slane %v1016_v26, %v2857_v42  ;;  %v1031_v46 = vcombine.low %v1008_v39, %v1023_v41  ;;  %v1032_v47 = vcombine.high %v1008_v39, %v1023_v41  ;;  %v1082_v48 = vcombine.high %v999_v40, %v2855_v37 }
 0x3a5   : > { %v1089_v50 = vrot.slane %v999_v40, %v2857_v42 }
 0x3a6   : > { %v1039_v51 = vrot.slane %v1031_v46, %v2863_v54  ;;  %v1046_v52 = vrot.slane %v1032_v47, %v2863_v54  ;;  %v1047_v53 = vcombine.low %v1015_v43, %v1030_v45  ;;  %v1048_v56 = vcombine.high %v1015_v43, %v1030_v45 }
 0x3a7   : > { %v1096_v57 = vrot.slane %v1082_v48, %v2857_v42  ;;  %v1097_v58 = vcombine.low %v1074_v49, %v1089_v50  ;;  %v1098_v59 = vcombine.high %v1074_v49, %v1089_v50 }
 0x3a8   : > { %v1055_v60 = vrot.slane %v1047_v53, %v2863_v54  ;;  %v1062_v37 = vrot.slane %v1048_v56, %v2863_v54  ;;  %v1133_v61 = vcombine.low %v1039_v51, %v1046_v52  ;;  %v2041_v36 = vcombine.high %v1039_v51, %v1046_v52  ;;  %v2275_v62 = vpop.eup %2274 }
 0x3a9   : > { %v1105_v63 = vrot.slane %v1097_v58, %v2863_v54  ;;  %v1112_v1 = vrot.slane %v1098_v59, %v2863_v54  ;;  %v1113_v2 = vcombine.low %v1081_v55, %v1096_v57  ;;  %v1114_v3 = vcombine.high %v1081_v55, %v1096_v57 }
 0x3aa   : > { %v2277_v5 = vpop.eup %2276  ;;  %v1140_v6 = vrot.slane %v1133_v61, %v2857_v42  ;;  %v1148_v7 = vrot.slane %v2041_v36, %v2857_v42  ;;  %v1149_v8 = vcombine.low %v1055_v60, %v1062_v37  ;;  %v2042_v10 = vcombine.high %v1055_v60, %v1062_v37 }
 0x3ab   : > { %v1121_v11 = vrot.slane %v1113_v2, %v2863_v54  ;;  %v1128_v13 = vrot.slane %v1114_v3, %v2863_v54  ;;  %v1183_v14 = vcombine.low %v1105_v63, %v1112_v1  ;;  %v2043_v15 = vcombine.high %v1105_v63, %v1112_v1 }
 0x3ac   : > { %v1156_v16 = vrot.slane %v1149_v8, %v2857_v42  ;;  %v1164_v17 = vrot.slane %v2042_v10, %v2857_v42  ;;  %v1459_v18 = vsel %vm1434_vm4, %v2275_v62, 0.0  ;;  %v1462_v19 = vsel %vm1434_vm4, %v2277_v5, 0.0 }
 0x3ad   : > { %v1190_v20 = vrot.slane %v1183_v14, %v2857_v42  ;;  %v1198_v21 = vrot.slane %v2043_v15, %v2857_v42  ;;  %v1199_v22 = vcombine.low %v1121_v11, %v1128_v13  ;;  %v2044_v23 = vcombine.high %v1121_v11, %v1128_v13  ;;  %1460 = vadd.xlane.f32.xlu0 %v1459_v18 }
 0x3ae   : > { %1463 = vadd.xlane.f32.xlu1 %v1462_v19  ;;  %v1165_v24 = vcombine.low %v1140_v6, %v1148_v7  ;;  %v1173_v25 = vcombine.low %v1156_v16, %v1164_v17  ;;  %v1471_v46 = vpack.c.bf16 %v2275_v62, %v2275_v62  ;;  %v1472_v49 = vpack.c.bf16 %v2277_v5, %v2277_v5 }
 0x3af   : > { %v1206_v27 = vrot.slane %v1199_v22, %v2857_v42  ;;  %v1214_v28 = vrot.slane %v2044_v23, %v2857_v42  ;;  %v1215_v29 = vcombine.low %v1190_v20, %v1198_v21 }
 0x3b0   : > { %v1180_v30 = vrot.slane %v1173_v25, %v2863_v54  ;;  %v1172_v31 = vrot.slane %v1165_v24, %v2863_v54 }
 0x3b1   : > { %v1223_v32 = vcombine.low %v1206_v27, %v1214_v28  ;;  %v1222_v34 = vrot.slane %v1215_v29, %v2863_v54 }
 0x3b2   : > { %v1181_v33 = vcombine.low %v1172_v31, %v1180_v30  ;;  %v1182_v43 = vcombine.high %v1172_v31, %v1180_v30 }
 0x3b3   : > { %v1230_v35 = vrot.slane %v1223_v32, %v2863_v54 }
 0x3b4   : > { %v1237_v26 = vshrl.u32 %v1181_v33, 16  ;;  %v1245_v48 = vshrl.u32 %v1182_v43, 16 }
 0x3b5   : > { %v1231_v38 = vcombine.low %v1222_v34, %v1230_v35  ;;  %v1232_v39 = vcombine.high %v1222_v34, %v1230_v35 }
 0x3b7   : > { %v1235_v40 = vpack.i.b16 %v1231_v38, %v1181_v33  ;;  %v1238_v41 = vshrl.u32 %v1231_v38, 16  ;;  %v1246_v45 = vshrl.u32 %v1232_v39, 16  ;;  %v1243_v47 = vpack.i.b16 %v1232_v39, %v1182_v43  ;;  %v2272_v43 = vld [vmem:[#allocation10] sm:$0xff]  }
 0x3b9   : > { %2140 = vmatpush3.bf16.msra.mxu1 %v1235_v40  ;;  %v1239_v44 = vpack.i.b16 %v1238_v41, %v1237_v26  ;;  %v1247_v50 = vpack.i.b16 %v1246_v45, %v1245_v48 }
 0x3ba   : > { %2151 = vmatprep.subr.bf16.mxu1 %v2521_v0 }
 0x3bb   : > { %2146 = vmatpush3.bf16.msra.mxu0 %v1239_v44 }
 0x3bc   : > { %2142 = vmatmul.mubr.msk.bf16.vlgmr.msra.gmra.mrb[12].mxu1 %vm1434_vm4, %v1471_v46  ;;  %2157 = vmatprep.subr.bf16.mxu0 %v2521_v0 }
 0x3bd   : > { %2152 = vmatpush3.bf16.msra.mxu1 %v1243_v47  ;;  %2153 = vmatprep.mubr.msk.bf16.mxu1 %vm2522_vm0, %v2521_v0 }
 0x3be   : > { %2148 = vmatmul.mubr.msk.bf16.vlgmr.msra.gmra.mrb[16].mxu0 %vm1434_vm4, %v1472_v49  ;;  %2163 = vmatprep.subr.bf16.mxu1 %v2521_v0 }
 0x3bf   : > { %2158 = vmatpush3.bf16.msra.mxu0 %v1247_v50  ;;  %2159 = vmatprep.mubr.msk.bf16.mxu0 %vm2522_vm0, %v2521_v0 }
 0x3ce   : > { %v1446_v51 = vpop.xlane.xlu0 %1445 }
 0x3cf   : > { %v1450_v52 = vsub.f32 %v2937_v12, %v1446_v51 }
 0x3d0   : > { %v1443_v53 = vpop.xlane.xlu1 %1442 }
 0x3d1   : > { %v1457_v56 = vmul.f32 1.442695, %v1450_v52  ;;  %v1449_v55 = vsub.f32 %v2935_v9, %v1443_v53 }
 0x3d3   : > { %2278 = vpow2.f32 %v1457_v56  ;;  %v1455_v57 = vmul.f32 1.442695, %v1449_v55 }
 0x3d5   : > { %2280 = vpow2.f32 %v1455_v57 }
 0x3dd   : > { %v2279_v58 = vpop.eup %2278 }
 0x3de   : > { %v1468_v59 = vsel %vm1434_vm4, %v2279_v58, 0.0  ;;  %v1474_v60 = vpack.c.bf16 %v2279_v58, %v2279_v58 }
 0x3df   : > { %v2281_v37 = vpop.eup %2280  ;;  %1469 = vadd.xlane.f32.xlu1 %v1468_v59 }
 0x3e0   : > { %2160 = vmatmul.mubr.msk.bf16.vlgmr.msra.gmra.mrb[20].mxu0 %vm1434_vm4, %v1474_v60  ;;  %v1465_v61 = vsel %vm1434_vm4, %v2281_v37, 0.0  ;;  %v1473_v36 = vpack.c.bf16 %v2281_v37, %v2281_v37  ;;  %v2273_v37 = vld [vmem:[#allocation10 + $0x8] sm:$0xff]  }
 0x3e1   : > { %1466 = vadd.xlane.f32.xlu0 %v1465_v61 }
 0x3e2   : > { %2154 = vmatmul.mubr.msk.bf16.vlgmr.msra.gmra.mrb[16].mxu1 %vm1434_vm4, %v1473_v36 }
 0x3e3   : > { %2167 = vmatprep.mubr.msk.bf16.mxu1 %vm2522_vm0, %v2521_v0  ;;  %2164 = vmatpush3.bf16.msra.mxu1 %v2272_v43 }
 0x3e4   : > { %2165 = vmatprep.subr.bf16.mxu1 %v2521_v0 }
 0x3e7   : > { %2166 = vmatpush3.bf16.msra.mxu1 %v2273_v37 }
 0x43a   : > { %v1461_v7 = vpop.xlane.xlu0 %1460 }
 0x43b   : > { %v1464_v6 = vpop.xlane.xlu1 %1463 }
 0x43c   : > { %2282 = vrcp.f32 %v1464_v6 }
 0x446   : > { %v2283_v11 = vpop.eup %2282 }
 0x46c   : > { %v1470_v8 = vpop.xlane.xlu1 %1469 }
 0x46d   : > { %2284 = vrcp.f32 %v1470_v8 }
 0x46e   : > { %v1467_v10 = vpop.xlane.xlu0 %1466  ;;  %2286 = vrcp.f32 %v1461_v7 }
 0x46f   : > { %2288 = vrcp.f32 %v1467_v10  ;;  %v2055_v10 = vld [vmem:[%s3079_s5] ss:$0 sm:$0xff] }
 0x477   : > { %v2285_v13 = vpop.eup %2284 }
 0x478   : > { %v2287_v15 = vpop.eup %2286 }
 0x479   : > { %v2289_v19 = vpop.eup %2288 }
 0x48f   : > { %v1512_v9 = vpop.f32.mrb[12].mxu1 }
 0x490   : > { %v2143_v12 = vpop.f32.mrb[13].mxu1  ;;  %v1651_v22 = vmul.f32 %v2287_v15, %v1512_v9 }
 0x491   : > { %v1515_v62 = vpop.f32.mrb[14].mxu1  ;;  %v1555_v63 = vpop.f32.mrb[16].mxu0 }
 0x492   : > { %v2144_v1 = vpop.f32.mrb[15].mxu1  ;;  %v2149_v2 = vpop.f32.mrb[17].mxu0  ;;  %v1652_v16 = vmul.f32 %v2283_v11, %v1555_v63 }
 0x493   : > { %v1558_v3 = vpop.f32.mrb[18].mxu0 }
 0x494   : > { %v2150_v5 = vpop.f32.mrb[19].mxu0 }
 0x4b3   : > { %v1641_v14 = vpop.f32.mrb[20].mxu0 }
 0x4b4   : > { %v1654_v17 = vmul.f32 %v2285_v13, %v1641_v14  ;;  %v2161_v18 = vpop.f32.mrb[21].mxu0 }
 0x4b5   : > { %v1598_v20 = vpop.f32.mrb[16].mxu1  ;;  %v1644_v21 = vpop.f32.mrb[22].mxu0 }
 0x4b6   : > { %v1671_v23 = vcombine.low %v1652_v16, %v1654_v17  ;;  %v1672_v24 = vcombine.high %v1652_v16, %v1654_v17  ;;  %v1653_v25 = vmul.f32 %v2289_v19, %v1598_v20  ;;  %v2155_v27 = vpop.f32.mrb[17].mxu1  ;;  %v2162_v28 = vpop.f32.mrb[23].mxu0 }
 0x4b7   : > { %v1601_v29 = vpop.f32.mrb[18].mxu1 }
 0x4b8   : > { %v1655_v30 = vcombine.low %v1651_v22, %v1653_v25  ;;  %v1656_v31 = vcombine.high %v1651_v22, %v1653_v25  ;;  %v2156_v32 = vpop.f32.mrb[19].mxu1  ;;  %v1679_v33 = vrot.slane %v1671_v23, %v2857_v42  ;;  %v1686_v34 = vrot.slane %v1672_v24, %v2857_v42 }
 0x4ba   : > { %v1663_v35 = vrot.slane %v1655_v30, %v2857_v42  ;;  %v1670_v38 = vrot.slane %v1656_v31, %v2857_v42 }
 0x4bc   : > { %v1687_v39 = vcombine.low %v1663_v35, %v1679_v33  ;;  %v1688_v40 = vcombine.high %v1663_v35, %v1679_v33  ;;  %v1703_v26 = vcombine.low %v1670_v38, %v1686_v34  ;;  %v1704_v41 = vcombine.high %v1670_v38, %v1686_v34 }
 0x4be   : > { %v1695_v44 = vrot.slane %v1687_v39, %v2863_v54  ;;  %v1702_v45 = vrot.slane %v1688_v40, %v2863_v54  ;;  %v1711_v46 = vrot.slane %v1703_v26, %v2863_v54  ;;  %v1718_v47 = vrot.slane %v1704_v41, %v2863_v54 }
 0x4c0   : > { %v1723_v48 = vcombine.low %v1695_v44, %v1702_v45  ;;  %v2053_v49 = vcombine.high %v1695_v44, %v1702_v45  ;;  %v1739_v50 = vcombine.low %v1711_v46, %v1718_v47  ;;  %v2054_v51 = vcombine.high %v1711_v46, %v1718_v47 }
 0x4c2   : > { %v1730_v52 = vrot.slane %v1723_v48, %v2857_v42  ;;  %v1738_v53 = vrot.slane %v2053_v49, %v2857_v42  ;;  %v1746_v56 = vrot.slane %v1739_v50, %v2857_v42  ;;  %v1754_v55 = vrot.slane %v2054_v51, %v2857_v42 }
 0x4c4   : > { %v1756_v57 = vcombine.high %v1730_v52, %v1738_v53  ;;  %v1772_v58 = vcombine.high %v1746_v56, %v1754_v55  ;;  %v1755_v59 = vcombine.low %v1730_v52, %v1738_v53  ;;  %v1771_v60 = vcombine.low %v1746_v56, %v1754_v55 }
 0x4c6   : > { %v1770_v61 = vrot.slane %v1756_v57, %v2863_v54  ;;  %v1786_v36 = vrot.slane %v1772_v58, %v2863_v54  ;;  %v1763_v9 = vrot.slane %v1755_v59, %v2863_v54  ;;  %v1779_v0 = vrot.slane %v1771_v60, %v2863_v54 }
 0x4c8   : > { %v1789_v12 = vcombine.low %v1770_v61, %v1786_v36  ;;  %v1788_v62 = vcombine.high %v1763_v9, %v1779_v0  ;;  %v1790_v63 = vcombine.high %v1770_v61, %v1786_v36  ;;  %v1787_v1 = vcombine.low %v1763_v9, %v1779_v0 }
 0x4ca   : > { %1796 = vrot.lane.b32.xlu1 %v1789_v12, %s2529_s16  ;;  %1792 = vrot.lane.b32.xlu0 %v1788_v62, %s2530_s17 }
 0x4ce   : > { %1800 = vrot.lane.b32.xlu1 %v1790_v63, %s2531_s10 }
 0x53c   : > { %v1797_v42 = vpop.permute.xlu1 %1796  ;;  %v1793_v2 = vpop.permute.xlu0 %1792 }
 0x53d   : > { %v1803_v3 = vsel %vm1249_vm3, %v1787_v1, %v1793_v2 }
 0x53e   : > { %v1804_v54 = vsel %vm1434_vm4, %v1803_v3, %v1797_v42 }
 0x540   : > { %v1801_v5 = vpop.permute.xlu1 %1800 }
 0x541   : > { %v1806_v6 = vsel %vm1805_vm5, %v1804_v54, %v1801_v5 }
 0x542   : > { %v1807_v7 = vadd.f32 %v1806_v6, %v2828_v4 }
 0x544   : > { %v1808_v8 = vpack.c.bf16 %v1807_v7, %v1807_v7 }
 0x546   : > { %2168 = vmatmul.mubr.msk.bf16.vlgmr.msra.gmra.mrb[20].mxu1 %vm374_vm2, %v1808_v8 }
 0x619   : > { %v1869_v11 = vpop.f32.mrb[20].mxu1 }
 0x61a   : > { %v1870_v13 = vadd.f32 %v2055_v10, %v1869_v11  ;;  %v2169_v14 = vpop.f32.mrb[21].mxu1 }
 0x61b   : > { %v1872_v4 = vpop.f32.mrb[22].mxu1 }
 0x61c   : > { %v2170_v15 = vpop.f32.mrb[23].mxu1  ;;  %1875 = vst.msk [vmem:[%s346_s26] sm:$0xff] %vm374_vm2, %v1870_v13 }
 0x61d   : > { %2447 = shalt.err (!%p2444_p10)
}
 0x61e   : > { %s2448_s2 = scalar_lea.hbm %s3029_s29, 128  ;;  %s2452_s16 = scalar_lea.hbm %s3080_s6, 256 }
 0x61f   : > { %p2449_p13 = scmp.ne.s32.totalorder %s3029_s29, %s2448_s2  ;;  %p2453_p9 = scmp.lt.u32.totalorder %s3029_s29, %s3080_s6 }
 0x620   : > { %p2454_p3 = scmp.lt.u32.totalorder %s2452_s16, %s2448_s2  ;;  %p2456_p12 = scmp.lt.u32.totalorder %s2448_s2, %s3029_s29 }
 0x621   : > { %p2450_p5 = pnand %p2449_p13, %p3105_p1 }
 0x622   : > { %p2455_p7 = por %p2454_p3, %p2453_p9 }
 0x623   : > { %p2451_p11 = pneg %p2450_p5 }
 0x624   : > { %p2457_p2 = por %p2456_p12, %p2455_p7 }
 0x626   : > { %p2458_p4 = pnand %p2457_p2, %p2451_p11 }
 0x628   : > { %2461 = shalt.err (!%p2458_p4)
}
 0x629   : > { %2187 = dma.vmem_to_hbm [thread:$0]  (%p3105_p1), %s3031_s13, 128, %s3029_s29, %s1877_s25  }
 0x62a PF: > { %s1902_s3 = sand.u32 1, %s2500_s21   ;;  %p3106_p0 = scmp.ne.s32.totalorder %s3089_s28, 0 }
 0x62b   : > { %p3107_p8 = scmp.ge.s32.totalorder %s2512_s24, 2  ;;  %s1903_s12 = scalar_lea.sflag [#allocation4], %s1902_s3 }
 0x62d   : > { %p2207_p6 = pnand %p3107_p8, %p3106_p0 }
 0x62f   : > { %2495 = dma.done.wait (!%p2207_p6), %s1903_s12, 128  }
 0x630   : > { %2497 = vsyncadd (!%p2207_p6), %s1903_s12, 4294967168  ;;  %p23_p10 = scmp.ge.s32.totalorder %s2708_s18, 4   ;;  %s3108_s21 = smov %s2504_s22 }
 0x631   : > { %s3109_s22 = smov %s2508_s23  ;;  %s3110_s23 = smov %s2718_s14 }
 0x632   : > { %s3111_s24 = smov %s2708_s18  ;;  %25 = sbr.rel (!%p23_p10) target bundleno = 12 (0xc), region = 115 }
 0x639   :  { %1908 = vsyncpa [#allocation3], 1 }
 0x63a   :  { %1910 = vsyncpa [#allocation3 + $0x1], 1 }
 0x63b   :  { %1911 = vsyncpa [#allocation6], 1 }
 0x63c   :  { %1913 = vsyncpa [#allocation6 + $0x1], 1 }
 0x63d   :  { %1914 = vsyncpa [#allocation9], 1 }
 0x63e   :  { %1915 = vsyncpa [#allocation4], 1 }
 0x63f   :  { %1917 = vsyncpa [#allocation4 + $0x1], 1 }

// kernel: tpu_custom_call.1
= control target key start
LH: loop header
LB: loop body
LE: loop exit
PB: predicated region body
PF: predicated region fallthrough
CT: control target
= control target key end

     0   :  { %s3074_s0 = inlined_call_operand.hbm [shape: f32[2,8,32], index: 0, kind: input, shape index: {}]   ;;  %s3075_s1 = inlined_call_operand.hbm [shape: f32[2,8,32], index: 1, kind: input, shape index: {}]   ;;  %s3076_s2 = inlined_call_operand.hbm [shape: bf16[32,32], index: 2, kind: input, shape index: {}]   ;;  %s3077_s3 = inlined_call_operand.hbm [shape: bf16[2,32,32], index: 3, kind: input, shape index: {}]   ;;  %s3078_s4 = inlined_call_operand.hbm [shape: bf16[32,32], index: 4, kind: input, shape index: {}]   ;;  %s3079_s5 = inlined_call_operand.vmem [shape: f32[1,32], index: 5, kind: input, shape index: {}]   ;;  %s3080_s6 = inlined_call_operand.hbm [shape: f32[2,8,32], index: 6, kind: output, shape index: {}]  }
   0x1   :  { %3085 = sst [smem:[#allocation17_spill]] %s3076_s2 }
   0x2   :  { %3086 = sst [smem:[#allocation18_spill]] %s3077_s3 }
   0x3   :  { %3087 = sst [smem:[#allocation19_spill]] %s3078_s4 }
   0x4   :  { %11 = vsyncpa [#allocation3], 0 }
   0x5   :  { %13 = vsyncpa [#allocation3 + $0x1], 0 }
   0x6   :  { %14 = vsyncpa [#allocation6], 0 }
   0x7   :  { %16 = vsyncpa [#allocation6 + $0x1], 0 }
   0x8   :  { %17 = vsyncpa [#allocation9], 0 }
   0x9   :  { %18 = vsyncpa [#allocation4], 0 }
   0xa   :  { %20 = vsyncpa [#allocation4 + $0x1], 0  ;;  %s2568_s21 = smov 0   ;;  %s2570_s22 = smov 0  }
   0xb   :  { %s2572_s23 = smov 0   ;;  %s2574_s24 = smov 0  }
   0xc LB: > { %s2589_s25 = sadd.s32 4294967295, %s2512_s24   ;;  %s2011_s26 = sadd.s32 4294967294, %s2512_s24   ;;  %s2512_s24 = sphi %s2574_s24, %s3111_s24   ;;  %s2508_s23 = sphi %s2572_s23, %s3110_s23   ;;  %s2504_s22 = sphi %s2570_s22, %s3109_s22   ;;  %s2500_s21 = sphi %s2568_s21, %s3108_s21  }
   0xd   : > { %p46_p0 = scmp.ne.s32.totalorder %s2504_s22, %s2500_s21  ;;  %p3081_p1 = scmp.eq.s32.totalorder %s2589_s25, 0 }
   0xe   : > { %p186_p3 = scmp.eq.s32.totalorder %s2011_s26, 1  ;;  %p2012_p5 = scmp.ge.s32.totalorder %s2512_s24, 1 }
   0xf   : > { %p2598_p4 = por %p3081_p1, %p46_p0  ;;  %p193_p7 = scmp.lt.s32.totalorder %s2512_s24, 3 }
  0x10   : > { %p2603_p6 = por %p186_p3, %p46_p0  ;;  %s2514_s30 = smov [#allocation7]  }
  0x11   : > { %s3088_s27 = scalar_select %p2598_p4, 1, 0 }
  0x12   : > { %s3089_s28 = scalar_select %p2603_p6, 1, 0 }
  0x13   : > { %p2608_p8 = pnand %p2012_p5, %p193_p7  ;;  %s205_s7 = sshll.u32 %s2514_s30, 4  ;;  %s2612_s7 = int_to_ptr.vmem [resolvable:$true] %s205_s7 }
  0x14   : > { %s2515_s9 = smov [#allocation8]   ;;  %s2516_s11 = smov [#allocation10]  }
  0x15   : > { %s3090_s29 = scalar_select %p2608_p8, 1, 0 }
  0x16   : > { %p2189_p9 = pneg %p2608_p8  ;;  %s218_s10 = sshll.u32 %s2515_s9, 4  ;;  %s2623_s10 = int_to_ptr.vmem [resolvable:$true] %s218_s10 }
  0x17   : > { %s2625_s12 = sshll.u32 %s2516_s11, 4  ;;  %s3092_s2 = sld [smem:[#allocation17_spill]]  ;;  %s232_s12 = int_to_ptr.vmem [resolvable:$true] %s2625_s12 }
  0x18   : > { %p2619_p11 = pnand %p2189_p9, %p3081_p1 }
  0x1a   : > { %p2635_p13 = pneg %p2619_p11 }
  0x1d   : > { %s2290_s15 = scalar_lea.hbm %s3092_s2, 256 }
  0x1e   : > { %p2291_p12 = scmp.ne.s32.totalorder %s3092_s2, %s2290_s15  ;;  %p2297_p5 = scmp.lt.u32.totalorder %s2290_s15, %s3092_s2 }
  0x20   : > { %p2293_p0 = pnand %p2635_p13, %p2291_p12 }
  0x22   : > { %p2294_p3 = pneg %p2293_p0 }
  0x24   : > { %p2299_p7 = pnand %p2297_p5, %p2294_p3 }
  0x26   : > { %2302 = shalt.err (!%p2299_p7)
}
  0x27   : > { %s2303_s26 = scalar_lea.vmem %s2612_s7, 256  ;;  %p2311_p2 = scmp.lt.s32.totalorder %s2612_s7, %s2612_s7 }
  0x28   : > { %p2304_p9 = scmp.ne.s32.totalorder %s2612_s7, %s2303_s26  ;;  %p2312_p6 = scmp.lt.s32.totalorder %s2303_s26, %s2303_s26 }
  0x2a   : > { %p2306_p10 = pnand %p2304_p9, %p2635_p13  ;;  %p2313_p12 = por %p2312_p6, %p2311_p2 }
  0x2c   : > { %p2307_p1 = pneg %p2306_p10 }
  0x2e   : > { %p2314_p0 = pnand %p2313_p12, %p2307_p1 }
  0x30   : > { %2317 = shalt.err (!%p2314_p0)
}
  0x31   : > { %s2517_s30 = smov 64   ;;  %s2518_s9 = smov 4  }
  0x32   : > { %2192 = dma.hbm_to_vmem [thread:$0]  (!%p2619_p11), %s3092_s2, 256, %s2612_s7, [#allocation6], %s2517_s30, %s2517_s30, %s2518_s9  }
  0x33   : > { %s3094_s3 = sld [smem:[#allocation18_spill]] }
  0x39   : > { %s2318_s16 = scalar_lea.hbm %s3094_s3, 512 }
  0x3a   : > { %p2319_p1 = scmp.ne.s32.totalorder %s3094_s3, %s2318_s16  ;;  %p2325_p10 = scmp.lt.u32.totalorder %s2318_s16, %s3094_s3 }
  0x3c   : > { %p2321_p2 = pnand %p2319_p1, %p2635_p13 }
  0x3e   : > { %p2322_p6 = pneg %p2321_p2 }
  0x40   : > { %p2327_p3 = pnand %p2325_p10, %p2322_p6 }
  0x42   : > { %2330 = shalt.err (!%p2327_p3)
}
  0x43   : > { %s2331_s7 = scalar_lea.vmem %s2623_s10, 512  ;;  %p2339_p12 = scmp.lt.s32.totalorder %s2623_s10, %s2623_s10 }
  0x44   : > { %p2332_p5 = scmp.ne.s32.totalorder %s2623_s10, %s2331_s7  ;;  %p2340_p0 = scmp.lt.s32.totalorder %s2331_s7, %s2331_s7 }
  0x46   : > { %p2334_p7 = pnand %p2332_p5, %p2635_p13  ;;  %p2341_p1 = por %p2340_p0, %p2339_p12 }
  0x48   : > { %p2335_p9 = pneg %p2334_p7 }
  0x4a   : > { %p2342_p2 = pnand %p2341_p1, %p2335_p9 }
  0x4c   : > { %2345 = shalt.err (!%p2342_p2)
}
  0x4d   : > { %2195 = dma.hbm_to_vmem [thread:$0]  (!%p2619_p11), %s3094_s3, 512, %s2623_s10, [#allocation9], %s2517_s30, %s2517_s30, %s2518_s9  }
  0x4e   : > { %s3095_s4 = sld [smem:[#allocation19_spill]] }
  0x54   : > { %s2346_s16 = scalar_lea.hbm %s3095_s4, 256 }
  0x55   : > { %p2347_p6 = scmp.ne.s32.totalorder %s3095_s4, %s2346_s16  ;;  %p2353_p5 = scmp.lt.u32.totalorder %s2346_s16, %s3095_s4 }
  0x57   : > { %p2349_p10 = pnand %p2347_p6, %p2635_p13 }
  0x59   : > { %p2350_p3 = pneg %p2349_p10 }
  0x5b   : > { %p2355_p7 = pnand %p2353_p5, %p2350_p3 }
  0x5d   : > { %2358 = shalt.err (!%p2355_p7)
}
  0x5e   : > { %s2359_s7 = scalar_lea.vmem %s232_s12, 256  ;;  %p2367_p1 = scmp.lt.s32.totalorder %s232_s12, %s232_s12 }
  0x5f   : > { %p2360_p9 = scmp.ne.s32.totalorder %s232_s12, %s2359_s7  ;;  %p2368_p2 = scmp.lt.s32.totalorder %s2359_s7, %s2359_s7 }
  0x61   : > { %p2362_p12 = pnand %p2360_p9, %p2635_p13  ;;  %p2369_p4 = por %p2368_p2, %p2367_p1 }
  0x63   : > { %p2363_p0 = pneg %p2362_p12 }
  0x65   : > { %p2370_p8 = pnand %p2369_p4, %p2363_p0 }
  0x67   : > { %2373 = shalt.err (!%p2370_p8)
}
  0x68   : > { %2198 = dma.hbm_to_vmem [thread:$0]  (!%p2619_p11), %s3095_s4, 256, %s232_s12, [#allocation9], %s2517_s30, %s2517_s30, %s2518_s9  }
  0x69   : > { %s2708_s18 = sadd.s32 1, %s2512_s24   ;;  %s33_s13 = sadd.s32 1, %s2508_s23 }
  0x6a   : > { %s30_s8 = ssub.s32 %s2512_s24, %s2708_s18  ;;  %p40_p8 = scmp.ne.s32.totalorder %s2508_s23, %s2504_s22 }
  0x6b   : > { %p31_p4 = scmp.eq.s32.totalorder %s30_s8, 0  ;;  %p41_p13 = scmp.eq.s32.totalorder %s2512_s24, 0 }
  0x6c   : > { %p2213_p6 = scmp.lt.s32.totalorder %s2512_s24, 2  ;;  %p3096_p3 = scmp.eq.s32.totalorder %s2589_s25, 1 }
  0x6d   : > { %s2718_s14 = scalar_select %p31_p4, %s2508_s23, %s33_s13  }
  0x6e   : > { %p42_p10 = por %p41_p13, %p40_p8  ;;  %p2722_p5 = por %p3096_p3, %p40_p8 }
  0x6f   : > { %s248_s16 = sand.u32 1, %s2508_s23   ;;  %s2018_s17 = sshll.u32 %s2512_s24, 7 }
  0x70   : > { %s3097_s15 = scalar_select %p2722_p5, 1, 0 }
  0x71   : > { %s2728_s12 = sshll.u32 %s248_s16, 3  ;;  %s2733_s19 = scalar_lea.hbm %s3074_s0, %s2018_s17 }
  0x72   : > { %s252_s20 = scalar_lea.vmem [#allocation2], %s2728_s12  ;;  %p2736_p11 = pnand %p2213_p6, %p42_p10 }
  0x73   : > { %s259_s26 = sshll.u32 %s252_s20, 4  ;;  %s2745_s8 = scalar_lea.hbm %s3075_s1, %s2018_s17  ;;  %s2740_s26 = int_to_ptr.vmem [resolvable:$true] %s259_s26 }
  0x74   : > { %s249_s13 = scalar_lea.sflag [#allocation3], %s248_s16  ;;  %s2374_s30 = scalar_lea.hbm %s2733_s19, 128 }
  0x75   : > { %p2375_p7 = scmp.ne.s32.totalorder %s2733_s19, %s2374_s30  ;;  %p2376_p9 = pneg %p2736_p11 }
  0x76   : > { %s2379_s2 = scalar_lea.hbm %s3074_s0, 256  ;;  %p2380_p1 = scmp.lt.u32.totalorder %s2733_s19, %s3074_s0 }
  0x77   : > { %p2377_p12 = pnand %p2376_p9, %p2375_p7  ;;  %p2381_p2 = scmp.lt.u32.totalorder %s2379_s2, %s2374_s30 }
  0x78   : > { %p2383_p8 = scmp.lt.u32.totalorder %s2374_s30, %s2733_s19 }
  0x79   : > { %p2378_p0 = pneg %p2377_p12  ;;  %p2382_p4 = por %p2381_p2, %p2380_p1 }
  0x7b   : > { %p2384_p13 = por %p2383_p8, %p2382_p4 }
  0x7d   : > { %p2385_p6 = pnand %p2384_p13, %p2378_p0 }
  0x7f   : > { %2388 = shalt.err (!%p2385_p6)
}
  0x80   : > { %s2389_s16 = scalar_lea.vmem %s2740_s26, 128  ;;  %s2519_s17 = smov [#allocation2]  }
  0x81   : > { %p2390_p10 = scmp.ne.s32.totalorder %s2740_s26, %s2389_s16  ;;  %s2394_s10 = sshll.u32 %s2519_s17, 4  ;;  %s2395_s10 = int_to_ptr.vmem [resolvable:$false] %s2394_s10 }
  0x82   : > { %s2396_s3 = scalar_lea.vmem %s2395_s10, 256  ;;  %p2397_p12 = scmp.lt.s32.totalorder %s2740_s26, %s2395_s10 }
  0x83   : > { %p2392_p3 = pnand %p2390_p10, %p2376_p9  ;;  %p2398_p1 = scmp.lt.s32.totalorder %s2396_s3, %s2389_s16 }
  0x85   : > { %p2393_p7 = pneg %p2392_p3  ;;  %p2399_p2 = por %p2398_p1, %p2397_p12 }
  0x87   : > { %p2400_p4 = pnand %p2399_p2, %p2393_p7 }
  0x89   : > { %2403 = shalt.err (!%p2400_p4)
}
  0x8a   : > { %2202 = dma.hbm_to_vmem [thread:$0]  (!%p2736_p11), %s2733_s19, 128, %s2740_s26, %s249_s13  }
  0x8b   : > { %s266_s2 = sand.u32 1, %s2512_s24   ;;  %s270_s4 = scalar_lea.vmem [#allocation5], %s2728_s12 }
  0x8c   : > { %s277_s11 = sshll.u32 %s270_s4, 4  ;;  %s267_s30 = scalar_lea.sflag [#allocation6], %s266_s2  ;;  %s278_s11 = int_to_ptr.vmem [resolvable:$true] %s277_s11 }
  0x8d   : > { %s2404_s9 = scalar_lea.hbm %s2745_s8, 128  ;;  %s2409_s17 = scalar_lea.hbm %s3075_s1, 256 }
  0x8e   : > { %p2405_p0 = scmp.ne.s32.totalorder %s2745_s8, %s2404_s9  ;;  %p2410_p6 = scmp.lt.u32.totalorder %s2745_s8, %s3075_s1 }
  0x8f   : > { %p2411_p10 = scmp.lt.u32.totalorder %s2409_s17, %s2404_s9  ;;  %p2413_p7 = scmp.lt.u32.totalorder %s2404_s9, %s2745_s8 }
  0x90   : > { %p2407_p8 = pnand %p2405_p0, %p2376_p9 }
  0x91   : > { %p2412_p3 = por %p2411_p10, %p2410_p6 }
  0x92   : > { %p2408_p13 = pneg %p2407_p8 }
  0x93   : > { %p2414_p12 = por %p2413_p7, %p2412_p3 }
  0x95   : > { %p2415_p1 = pnand %p2414_p12, %p2408_p13 }
  0x97   : > { %2418 = shalt.err (!%p2415_p1)
}
  0x98   : > { %s2419_s12 = scalar_lea.vmem %s278_s11, 128  ;;  %s2520_s19 = smov [#allocation5]  }
  0x99   : > { %p2420_p2 = scmp.ne.s32.totalorder %s278_s11, %s2419_s12  ;;  %s2424_s26 = sshll.u32 %s2520_s19, 4  ;;  %s2425_s26 = int_to_ptr.vmem [resolvable:$false] %s2424_s26 }
  0x9a   : > { %s2426_s13 = scalar_lea.vmem %s2425_s26, 256  ;;  %p2427_p8 = scmp.lt.s32.totalorder %s278_s11, %s2425_s26 }
  0x9b   : > { %p2422_p4 = pnand %p2420_p2, %p2376_p9  ;;  %p2428_p5 = scmp.lt.s32.totalorder %s2426_s13, %s2419_s12 }
  0x9d   : > { %p2423_p0 = pneg %p2422_p4  ;;  %p2429_p6 = por %p2428_p5, %p2427_p8 }
  0x9f   : > { %p2430_p10 = pnand %p2429_p6, %p2423_p0 }
  0xa1   : > { %2433 = shalt.err (!%p2430_p10)
}
  0xa2   : > { %2205 = dma.hbm_to_vmem [thread:$0]  (!%p2736_p11), %s2745_s8, 128, %s278_s11, %s267_s30  }
  0xa3   : > { %p3099_p13 = scmp.ne.s32.totalorder %s3090_s29, 0 }
  0xa4   : > { %s2796_s2 = sand.u32 (!%p3099_p13), 1, %s2504_s22   ;;  %p3100_p5 = scmp.ne.s32.totalorder (!%p3099_p13), %s3088_s27, 0 }
  0xa5   : > { %286 = sbr.rel (%p3099_p13) target bundleno = 1578 (0x62a), region = 44  ;;  %s2799_s4 = sshll.u32 (!%p3099_p13), %s2796_s2, 3 }
  0xa6   : > { %s289_s9 = scalar_lea.sflag (!%p3099_p13), [#allocation3], %s2796_s2  ;;  %s292_s20 = scalar_lea.vmem (!%p3099_p13), [#allocation2], %s2799_s4 }
  0xac   : > { %2479 = dma.done.wait (%p3100_p5), %s289_s9, 128  }
  0xad   : > { %2481 = vsyncadd (%p3100_p5), %s289_s9, 4294967168  ;;  %s297_s29 = sand.u32 1, %s2589_s25   ;;  %s301_s8 = scalar_lea.vmem [#allocation5], %s2799_s4 }
  0xae   : > { %s298_s7 = scalar_lea.sflag [#allocation6], %s297_s29 }
  0xaf   : > { %2483 = dma.done.wait (%p3100_p5), %s298_s7, 128  }
  0xb0   : > { %2485 = vsyncadd (%p3100_p5), %s298_s7, 4294967168  ;;  %p3101_p11 = scmp.eq.s32.totalorder %s2589_s25, 0 }
  0xb2   : > { %2487 = dma.done.wait (%p3101_p11), [#allocation6], 256   ;;  %p3102_p9 = pmov %p3101_p11 }
  0xb4   : > { %2489 = vsyncadd (%p3102_p9), [#allocation6], 4294967040  ;;  %p3103_p3 = pmov %p3102_p9 }
  0xb6   : > { %2491 = dma.done.wait (%p3103_p3), [#allocation9], 768   ;;  %p3104_p7 = pmov %p3103_p3 }
  0xb7   : > { %v2521_v0 = vmov 0.0   ;;  %vm2522_vm0 = vmmov 0   ;;  %v2266_v1 = vld [vmem:[#allocation8] sm:$0xff]   ;;  %v2267_v2 = vld [vmem:[#allocation8 + $0x8] sm:$0xff]   ;;  %v2268_v3 = vld [vmem:[#allocation7] sm:$0xff]   ;;  %vm354_vm1 = vcmask 1043456   ;;  %v545_v30 = vlaneseq }
  0xb8   : > { %2493 = vsyncadd (%p3104_p7), [#allocation9], 4294966528  ;;  %2099 = vmatprep.subr.bf16.mxu1 %v2521_v0  ;;  %2091 = vmatprep.subr.bf16.mxu0 %v2521_v0  ;;  %v2828_v4 = vld [vmem:[%s292_s20] sm:$0xff]  ;;  %v350_v5 = vld [vmem:[%s301_s8] sm:$0xff]  ;;  %vm374_vm2 = vcmask 261120   ;;  %s2523_s27 = smov 104  }
  0xb9   : > { %2103 = vmatprep.mubr.msk.bf16.mxu1 %vm2522_vm0, %v2521_v0  ;;  %2095 = vmatprep.mubr.msk.bf16.mxu0 %vm2522_vm0, %v2521_v0  ;;  %v349_v6 = vpack.c.bf16 %v2828_v4, %v2828_v4  ;;  %v351_v7 = vpack.c.bf16 %v350_v5, %v350_v5  ;;  %v2269_v8 = vld [vmem:[#allocation7 + $0x8] sm:$0xff]   ;;  %v2270_v11 = vld [vmem:[#allocation8 + $0x10] sm:$0xff]   ;;  %s2524_s11 = smov 120   ;;  %s2525_s30 = smov 112   ;;  %v2526_v28 = vmov 1983009808  }
  0xba   : > { %2100 = vmatpush3.bf16.msra.mxu1 %v2266_v1  ;;  %2092 = vmatpush3.bf16.msra.mxu0 %v2268_v3  ;;  %v2271_v12 = vld [vmem:[#allocation8 + $0x18] sm:$0xff]   ;;  %v543_v29 = vunpack.c.l.s4 %v2526_v28  ;;  %v546_v32 = vshrl.u32 %v545_v30, 7  ;;  %v2527_v33 = vmov 1934713408   ;;  %v2528_v36 = vmov 0   ;;  %s2529_s16 = smov 16  }
  0xbb   : > { %2101 = vmatprep.subr.bf16.mxu1 %v2521_v0  ;;  %2093 = vmatprep.subr.bf16.mxu0 %v2521_v0  ;;  %v353_v9 = vrot.slane %v351_v7, 4  ;;  %v560_v34 = vunpack.c.l.s4 %v2527_v33  ;;  %v2855_v37 = vpack.i.b16 %v2528_v36, %v2528_v36  ;;  %vm1249_vm3 = vcmask 64512   ;;  %s2530_s17 = smov 8   ;;  %s2531_s10 = smov 24  }
  0xbc   : > { %v544_v31 = vunpack.c.0.s8 %v543_v29  ;;  %vm1434_vm4 = vcmask 130048   ;;  %vm1805_vm5 = vcmask 195584   ;;  %s2060_s19 = sshll.u32 %s2589_s25, 7  ;;  %s346_s26 = scalar_lea.vmem [#allocation11], %s2799_s4 }
  0xbd   : > { %v357_v10 = vsel %vm354_vm1, %v349_v6, %v353_v9  ;;  %v561_v44 = vunpack.c.0.s8 %v560_v34  ;;  %s1890_s13 = sshll.u32 %s346_s26, 4  ;;  %s3029_s29 = scalar_lea.hbm %s3080_s6, %s2060_s19  ;;  %s3031_s13 = int_to_ptr.vmem [resolvable:$true] %s1890_s13 }
  0xbe   : > { %2102 = vmatpush3.bf16.msra.mxu1 %v2267_v2  ;;  %2094 = vmatpush3.bf16.msra.mxu0 %v2269_v8  ;;  %v2857_v42 = vsub.s32 %v544_v31, %v546_v32  ;;  %s1877_s25 = scalar_lea.sflag [#allocation4], %s2796_s2  ;;  %s2434_s4 = scalar_lea.vmem %s3031_s13, 128 }
  0xbf   : > { %2115 = vmatprep.subr.bf16.mxu1 %v2521_v0  ;;  %2107 = vmatprep.subr.bf16.mxu0 %v2521_v0  ;;  %v2863_v54 = vsub.s32 %v561_v44, %v546_v32  ;;  %p2435_p12 = scmp.ne.s32.totalorder %s3031_s13, %s2434_s4  ;;  %p3105_p1 = scmp.ne.s32.totalorder %s3097_s15, 0 }
  0xc0   : > { %s2532_s7 = smov [#allocation11]  }
  0xc1   : > { %2104 = vmatmul.mubr.msk.bf16.vlgmr.msra.gmra.mrb[0].mxu1 %vm374_vm2, %v357_v10  ;;  %2096 = vmatmul.mubr.msk.bf16.vlgmr.msra.gmra.mrb[0].mxu0 %vm374_vm2, %v349_v6  ;;  %p2436_p2 = pnand %p2435_p12, %p3105_p1  ;;  %s2438_s8 = sshll.u32 %s2532_s7, 4  ;;  %s2439_s8 = int_to_ptr.vmem [resolvable:$false] %s2438_s8 }
  0xc2   : > { %2117 = vmatprep.mubr.msk.bf16.mxu1 %vm2522_vm0, %v2521_v0  ;;  %2111 = vmatprep.mubr.msk.bf16.mxu0 %vm2522_vm0, %v2521_v0  ;;  %p2441_p0 = scmp.lt.s32.totalorder %s3031_s13, %s2439_s8 }
  0xc3   : > { %2108 = vmatpush3.bf16.msra.mxu0 %v2270_v11  ;;  %p2437_p4 = pneg %p2436_p2 }
  0xc4   : > { %2109 = vmatprep.subr.bf16.mxu0 %v2521_v0 }
  0xc7   : > { %2110 = vmatpush3.bf16.msra.mxu0 %v2271_v12 }
  0xc8   : > { %2121 = vmatprep.subr.bf16.mxu0 %v2521_v0 }
  0xca   : > { %2112 = vmatmul.mubr.msk.bf16.vlgmr.msra.gmra.mrb[4].mxu0 %vm374_vm2, %v357_v10 }
  0xcb   : > { %2123 = vmatprep.mubr.msk.bf16.mxu0 %vm2522_vm0, %v2521_v0 }
 0x194   : > { %v469_v13 = vpop.f32.mrb[0].mxu1  ;;  %v411_v16 = vpop.f32.mrb[0].mxu0 }
 0x195   : > { %v2105_v14 = vpop.f32.mrb[1].mxu1  ;;  %v2097_v19 = vpop.f32.mrb[1].mxu0  ;;  %v534_v21 = vpack.c.bf16 %v411_v16, %v411_v16 }
 0x196   : > { %v472_v15 = vpop.f32.mrb[2].mxu1  ;;  %v414_v20 = vpop.f32.mrb[2].mxu0 }
 0x197   : > { %v703_v17 = vpack.c.bf16 %v472_v15, %v469_v13  ;;  %v2106_v18 = vpop.f32.mrb[3].mxu1  ;;  %v2098_v22 = vpop.f32.mrb[3].mxu0  ;;  %v548_v55 = vrot.slane %v534_v21, %v2857_v42 }
 0x199   : > { %709 = vrot.lane.b32.xlu1 %v703_v17, %s2523_s27  ;;  %705 = vrot.lane.b32.xlu0 %v703_v17, %s2524_s11  ;;  %v715_v40 = vshrl.u32 %v703_v17, 16 }
 0x19d   : > { %536 = vrot.lane.b32.xlu1 %v534_v21, %s2524_s11  ;;  %707 = vrot.lane.b32.xlu0 %v703_v17, %s2525_s30  ;;  %v527_v23 = vpop.f32.mrb[4].mxu0 }
 0x19e   : > { %v2113_v24 = vpop.f32.mrb[5].mxu0 }
 0x19f   : > { %v530_v25 = vpop.f32.mrb[6].mxu0 }
 0x1a0   : > { %v2850_v26 = vpack.c.bf16 %v530_v25, %v527_v23  ;;  %v2114_v27 = vpop.f32.mrb[7].mxu0 }
 0x1a1   : > { %540 = vrot.lane.b32.xlu1 %v534_v21, %s2523_s27  ;;  %538 = vrot.lane.b32.xlu0 %v534_v21, %s2525_s30 }
 0x1a5   : > { %979 = vrot.lane.b32.xlu0 %v2850_v26, %s2524_s11 }
 0x20b   : > { %v710_v35 = vpop.permute.xlu1 %709  ;;  %v706_v38 = vpop.permute.xlu0 %705 }
 0x20c   : > { %v713_v39 = vpack.i.b16 %v706_v38, %v703_v17  ;;  %v716_v41 = vshrl.u32 %v706_v38, 16  ;;  %v724_v49 = vshrl.u32 %v710_v35, 16 }
 0x20e   : > { %v717_v43 = vpack.i.b16 %v716_v41, %v715_v40  ;;  %v733_v45 = vcombine.high %v713_v39, %v2855_v37  ;;  %v740_v52 = vrot.slane %v713_v39, %v2857_v42 }
 0x20f   : > { %v537_v46 = vpop.permute.xlu1 %536  ;;  %v708_v47 = vpop.permute.xlu0 %707 }
 0x210   : > { %v799_v48 = vcombine.high %v717_v43, %v2855_v37  ;;  %v721_v50 = vpack.i.b16 %v710_v35, %v708_v47  ;;  %v723_v51 = vshrl.u32 %v708_v47, 16  ;;  %v582_v53 = vrot.slane %v537_v46, %v2857_v42 }
 0x211   : > { %v747_v56 = vrot.slane %v733_v45, %v2857_v42  ;;  %v806_v62 = vrot.slane %v717_v43, %v2857_v42 }
 0x212   : > { %v725_v57 = vpack.i.b16 %v724_v49, %v723_v51  ;;  %v748_v58 = vcombine.high %v721_v50, %v2855_v37  ;;  %v755_v59 = vrot.slane %v721_v50, %v2857_v42  ;;  %v813_v63 = vrot.slane %v799_v48, %v2857_v42 }
 0x213   : > { %v541_v60 = vpop.permute.xlu1 %540  ;;  %v539_v61 = vpop.permute.xlu0 %538 }
 0x214   : > { %v590_v1 = vrot.slane %v541_v60, %v2857_v42  ;;  %v556_v2 = vrot.slane %v539_v61, %v2857_v42  ;;  %v762_v3 = vrot.slane %v748_v58, %v2857_v42  ;;  %v763_v5 = vcombine.low %v740_v52, %v755_v59 }
 0x215   : > { %v764_v6 = vcombine.high %v740_v52, %v755_v59  ;;  %v814_v7 = vcombine.high %v725_v57, %v2855_v37  ;;  %v821_v8 = vrot.slane %v725_v57, %v2857_v42 }
 0x216   : > { %v591_v9 = vcombine.low %v582_v53, %v590_v1  ;;  %v592_v10 = vcombine.high %v582_v53, %v590_v1  ;;  %v557_v11 = vcombine.low %v548_v55, %v556_v2  ;;  %v771_v12 = vrot.slane %v763_v5, %v2863_v54 }
 0x217   : > { %v778_v13 = vrot.slane %v764_v6, %v2863_v54  ;;  %v779_v14 = vcombine.low %v747_v56, %v762_v3  ;;  %v780_v15 = vcombine.high %v747_v56, %v762_v3  ;;  %v828_v16 = vrot.slane %v814_v7, %v2857_v42 }
 0x218   : > { %v829_v17 = vcombine.low %v806_v62, %v821_v8  ;;  %v830_v18 = vcombine.high %v806_v62, %v821_v8  ;;  %v599_v19 = vrot.slane %v591_v9, %v2863_v54  ;;  %v606_v38 = vrot.slane %v592_v10, %v2863_v54 }
 0x219   : > { %v787_v20 = vrot.slane %v779_v14, %v2863_v54  ;;  %v794_v21 = vrot.slane %v780_v15, %v2863_v54  ;;  %v865_v22 = vcombine.low %v771_v12, %v778_v13  ;;  %v2037_v23 = vcombine.high %v771_v12, %v778_v13 }
 0x21a   : > { %v837_v24 = vrot.slane %v829_v17, %v2863_v54  ;;  %v844_v25 = vrot.slane %v830_v18, %v2863_v54  ;;  %v845_v27 = vcombine.low %v813_v63, %v828_v16  ;;  %v846_v28 = vcombine.high %v813_v63, %v828_v16 }
 0x21b   : > { %v872_v29 = vrot.slane %v865_v22, %v2857_v42  ;;  %v881_v30 = vcombine.low %v787_v20, %v794_v21  ;;  %v880_v33 = vrot.slane %v2037_v23, %v2857_v42  ;;  %v2038_v34 = vcombine.high %v787_v20, %v794_v21 }
 0x21c   : > { %v853_v31 = vrot.slane %v845_v27, %v2863_v54  ;;  %v860_v32 = vrot.slane %v846_v28, %v2863_v54  ;;  %v915_v35 = vcombine.low %v837_v24, %v844_v25  ;;  %v607_v39 = vcombine.high %v599_v19, %v2528_v36 }
 0x21d   : > { %v558_v40 = vcombine.high %v548_v55, %v556_v2  ;;  %v2039_v41 = vcombine.high %v837_v24, %v844_v25  ;;  %v614_v44 = vshrl.u32 %v599_v19, 16  ;;  %v565_v45 = vrot.slane %v557_v11, %v2863_v54 }
 0x21e   : > { %v931_v43 = vcombine.low %v853_v31, %v860_v32  ;;  %v608_v46 = vcombine.high %v606_v38, %v2528_v36  ;;  %v630_v47 = vshrl.u32 %v606_v38, 16  ;;  %v888_v49 = vrot.slane %v881_v30, %v2857_v42 }
 0x21f   : > { %v572_v48 = vrot.slane %v558_v40, %v2863_v54  ;;  %v622_v50 = vshrl.u32 %v607_v39, 16  ;;  %v573_v51 = vcombine.high %v565_v45, %v2528_v36  ;;  %v613_v52 = vshrl.u32 %v565_v45, 16 }
 0x220   : > { %v896_v53 = vrot.slane %v2038_v34, %v2857_v42  ;;  %v2040_v56 = vcombine.high %v853_v31, %v860_v32  ;;  %v638_v55 = vshrl.u32 %v608_v46, 16  ;;  %v611_v59 = vpack.i.b16 %v599_v19, %v565_v45 }
 0x221   : > { %v574_v57 = vcombine.high %v572_v48, %v2528_v36  ;;  %v629_v58 = vshrl.u32 %v572_v48, 16  ;;  %v615_v60 = vpack.i.b16 %v614_v44, %v613_v52  ;;  %v619_v61 = vpack.i.b16 %v607_v39, %v573_v51 }
 0x222   : > { %v621_v62 = vshrl.u32 %v573_v51, 16  ;;  %v627_v63 = vpack.i.b16 %v606_v38, %v572_v48  ;;  %v897_v6 = vcombine.low %v872_v29, %v880_v33  ;;  %v905_v7 = vcombine.low %v888_v49, %v896_v53 }
 0x223   : > { %v631_v1 = vpack.i.b16 %v630_v47, %v629_v58  ;;  %v635_v2 = vpack.i.b16 %v608_v46, %v574_v57  ;;  %v637_v3 = vshrl.u32 %v574_v57, 16  ;;  %v922_v8 = vrot.slane %v915_v35, %v2857_v42 }
 0x224   : > { %v623_v5 = vpack.i.b16 %v622_v50, %v621_v62  ;;  %v912_v12 = vrot.slane %v905_v7, %v2863_v54  ;;  %v930_v13 = vrot.slane %v2039_v41, %v2857_v42  ;;  %v938_v14 = vrot.slane %v931_v43, %v2857_v42 }
 0x225   : > { %v639_v9 = vpack.i.b16 %v638_v55, %v637_v3  ;;  %v649_v10 = vcombine.low %v619_v61, %v635_v2  ;;  %v666_v11 = vcombine.low %v615_v60, %v631_v1  ;;  %v946_v15 = vrot.slane %v2040_v56, %v2857_v42 }
 0x226   : > { %v641_v16 = vcombine.low %v611_v59, %v627_v63  ;;  %v904_v18 = vrot.slane %v897_v6, %v2863_v54  ;;  %v947_v19 = vcombine.low %v922_v8, %v930_v13 }
 0x227   : > { %v674_v17 = vcombine.low %v623_v5, %v639_v9  ;;  %v955_v20 = vcombine.low %v938_v14, %v946_v15  ;;  %v656_v21 = vrot.slane %v649_v10, %v2857_v42  ;;  %v673_v23 = vrot.slane %v666_v11, %v2857_v42 }
 0x228   : > { %v913_v24 = vcombine.low %v904_v18, %v912_v12  ;;  %v954_v25 = vrot.slane %v947_v19, %v2863_v54  ;;  %v648_v28 = vrot.slane %v641_v16, %v2857_v42  ;;  %v914_v41 = vcombine.high %v904_v18, %v912_v12  ;;  %v980_v19 = vpop.permute.xlu0 %979 }
 0x229   : > { %v681_v22 = vrot.slane %v674_v17, %v2857_v42  ;;  %v962_v27 = vrot.slane %v955_v20, %v2863_v54 }
 0x22a   : > { %v657_v31 = vcombine.low %v648_v28, %v656_v21  ;;  %v968_v33 = vshrl.u32 %v913_v24, 16  ;;  %v974_v48 = vshrl.u32 %v914_v41, 16 }
 0x22b   : > { %v682_v29 = vcombine.low %v673_v23, %v681_v22  ;;  %v963_v30 = vcombine.low %v954_v25, %v962_v27  ;;  %v964_v35 = vcombine.high %v954_v25, %v962_v27  ;;  %v989_v22 = vshrl.u32 %v2850_v26, 16 }
 0x22c   : > { %v664_v44 = vrot.slane %v657_v31, %v2863_v54  ;;  %v987_v23 = vpack.i.b16 %v980_v19, %v2850_v26 }
 0x22d   : > { %v967_v32 = vpack.i.b16 %v963_v30, %v913_v24  ;;  %v969_v34 = vshrl.u32 %v963_v30, 16  ;;  %v689_v40 = vrot.slane %v682_v29, %v2863_v54  ;;  %v975_v45 = vshrl.u32 %v964_v35, 16 }
 0x22e   : > { %v973_v46 = vpack.i.b16 %v964_v35, %v914_v41  ;;  %v694_v50 = vshrl.u32 %v664_v44, 16  ;;  %v665_v57 = vcombine.high %v664_v44, %v2528_v36  ;;  %v990_v24 = vshrl.u32 %v980_v19, 16 }
 0x22f   : > { %v1254_v38 = vsel %vm1249_vm3, %v967_v32, 0  ;;  %v970_v39 = vpack.i.b16 %v969_v34, %v968_v33  ;;  %v695_v47 = vshrl.u32 %v689_v40, 16  ;;  %v693_v49 = vpack.i.b16 %v689_v40, %v664_v44 }
 0x230   : > { %2116 = vmatpush3.bf16.xpose.msra.mxu1 %v1254_v38  ;;  %v976_v51 = vpack.i.b16 %v975_v45, %v974_v48  ;;  %v1346_v52 = vsel %vm1249_vm3, %v973_v46, 0  ;;  %v690_v56 = vcombine.high %v689_v40, %v2528_v36  ;;  %v700_v60 = vshrl.u32 %v665_v57, 16 }
 0x231   : > { %v1300_v43 = vsel %vm1249_vm3, %v970_v39, 0  ;;  %2127 = vmatprep.subr.bf16.mxu1 %v2521_v0  ;;  %v696_v53 = vpack.i.b16 %v695_v47, %v694_v50  ;;  %v991_v31 = vpack.i.b16 %v990_v24, %v989_v22  ;;  %v1001_v32 = vcombine.high %v987_v23, %v2855_v37 }
 0x232   : > { %2122 = vmatpush3.bf16.xpose.msra.mxu0 %v1300_v43  ;;  %v1392_v55 = vsel %vm1249_vm3, %v976_v51, 0  ;;  %v701_v58 = vshrl.u32 %v690_v56, 16  ;;  %v699_v59 = vpack.i.b16 %v690_v56, %v665_v57  ;;  %v1008_v39 = vrot.slane %v987_v23, %v2857_v42 }
 0x233   : > { %2133 = vmatprep.subr.bf16.mxu0 %v2521_v0  ;;  %v1015_v43 = vrot.slane %v1001_v32, %v2857_v42  ;;  %v1067_v44 = vcombine.high %v991_v31, %v2855_v37 }
 0x234   : > { %v702_v61 = vpack.i.b16 %v701_v58, %v700_v60 }
 0x237   : > { %2118 = vmatmul.mubr.msk.bf16.vlgmr.msra.gmra.mrb[4].mxu1 %vm1249_vm3, %v693_v49  ;;  %v1074_v49 = vrot.slane %v991_v31, %v2857_v42 }
 0x238   : > { %2128 = vmatpush3.bf16.xpose.msra.mxu1 %v1346_v52  ;;  %2129 = vmatprep.mubr.msk.bf16.mxu1 %vm2522_vm0, %v2521_v0 }
 0x239   : > { %2124 = vmatmul.mubr.msk.bf16.vlgmr.msra.gmra.mrb[8].mxu0 %vm1249_vm3, %v696_v53  ;;  %2139 = vmatprep.subr.bf16.mxu1 %v2521_v0 }
 0x23a   : > { %2134 = vmatpush3.bf16.xpose.msra.mxu0 %v1392_v55  ;;  %2135 = vmatprep.mubr.msk.bf16.mxu0 %vm2522_vm0, %v2521_v0  ;;  %v1081_v55 = vrot.slane %v1067_v44, %v2857_v42 }
 0x23b   : > { %2145 = vmatprep.subr.bf16.mxu0 %v2521_v0 }
 0x23f   : > { %2130 = vmatmul.mubr.msk.bf16.vlgmr.msra.gmra.mrb[8].mxu1 %vm1249_vm3, %v699_v59 }
 0x240   : > { %2141 = vmatprep.mubr.msk.bf16.mxu1 %vm2522_vm0, %v2521_v0 }
 0x241   : > { %2136 = vmatmul.mubr.msk.bf16.vlgmr.msra.gmra.mrb[12].mxu0 %vm1249_vm3, %v702_v61 }
 0x242   : > { %2147 = vmatprep.mubr.msk.bf16.mxu0 %vm2522_vm0, %v2521_v0 }
 0x30a   : > { %v1290_v36 = vpop.f32.mrb[4].mxu1 }
 0x30b   : > { %v2119_v62 = vpop.f32.mrb[5].mxu1  ;;  %v1435_v63 = vsel %vm1434_vm4, %v1290_v36, -inf }
 0x30c   : > { %v1336_v1 = vpop.f32.mrb[8].mxu0  ;;  %1436 = vmax.xlane.f32.xlu0 %v1435_v63  ;;  %v1293_v2 = vpop.f32.mrb[6].mxu1 }
 0x30d   : > { %v2120_v3 = vpop.f32.mrb[7].mxu1  ;;  %v2125_v5 = vpop.f32.mrb[9].mxu0  ;;  %v1438_v6 = vsel %vm1434_vm4, %v1336_v1, -inf }
 0x30e   : > { %1439 = vmax.xlane.f32.xlu1 %v1438_v6  ;;  %v1339_v7 = vpop.f32.mrb[10].mxu0 }
 0x30f   : > { %v2126_v8 = vpop.f32.mrb[11].mxu0 }
 0x312   : > { %v2935_v9 = vpop.f32.mrb[8].mxu1 }
 0x313   : > { %v2131_v10 = vpop.f32.mrb[9].mxu1  ;;  %v1441_v18 = vsel %vm1434_vm4, %v2935_v9, -inf }
 0x314   : > { %v1385_v11 = vpop.f32.mrb[10].mxu1  ;;  %v2937_v12 = vpop.f32.mrb[12].mxu0 }
 0x315   : > { %v2132_v13 = vpop.f32.mrb[11].mxu1  ;;  %v2137_v14 = vpop.f32.mrb[13].mxu0  ;;  %v1444_v17 = vsel %vm1434_vm4, %v2937_v12, -inf }
 0x316   : > { %v1431_v15 = vpop.f32.mrb[14].mxu0 }
 0x317   : > { %v2138_v16 = vpop.f32.mrb[15].mxu0 }
 0x31f   : > { %981 = vrot.lane.b32.xlu1 %v2850_v26, %s2525_s30 }
 0x322   : > { %983 = vrot.lane.b32.xlu0 %v2850_v26, %s2523_s27  ;;  %s2440_s27 = scalar_lea.vmem %s2439_s8, 256 }
 0x323   : > { %p2442_p8 = scmp.lt.s32.totalorder %s2440_s27, %s2434_s4 }
 0x325   : > { %p2443_p6 = por %p2442_p8, %p2441_p0 }
 0x327   : > { %p2444_p10 = pnand %p2443_p6, %p2437_p4 }
 0x341   : > { %1445 = vmax.xlane.f32.xlu0 %v1444_v17 }
 0x343   : > { %1442 = vmax.xlane.f32.xlu1 %v1441_v18 }
 0x399   : > { %v1437_v20 = vpop.xlane.xlu0 %1436 }
 0x39a   : > { %v1447_v21 = vsub.f32 %v1290_v36, %v1437_v20 }
 0x39b   : > { %v1440_v25 = vpop.xlane.xlu1 %1439 }
 0x39c   : > { %v1451_v27 = vmul.f32 1.442695, %v1447_v21  ;;  %v1448_v28 = vsub.f32 %v1336_v1, %v1440_v25 }
 0x39d   : > { %v984_v29 = vpop.permute.xlu0 %983 }
 0x39e   : > { %v1453_v30 = vmul.f32 1.442695, %v1448_v28  ;;  %2274 = vpow2.f32 %v1451_v27  ;;  %v998_v34 = vshrl.u32 %v984_v29, 16 }
 0x39f   : > { %v982_v33 = vpop.permute.xlu1 %981 }
 0x3a0   : > { %2276 = vpow2.f32 %v1453_v30  ;;  %v995_v35 = vpack.i.b16 %v984_v29, %v982_v33  ;;  %v997_v38 = vshrl.u32 %v982_v33, 16 }
 0x3a2   : > { %v999_v40 = vpack.i.b16 %v998_v34, %v997_v38  ;;  %v1016_v26 = vcombine.high %v995_v35, %v2855_v37  ;;  %v1023_v41 = vrot.slane %v995_v35, %v2857_v42 }
 0x3a4   : > { %v1030_v45 = vrot.slane %v1016_v26, %v2857_v42  ;;  %v1031_v46 = vcombine.low %v1008_v39, %v1023_v41  ;;  %v1032_v47 = vcombine.high %v1008_v39, %v1023_v41  ;;  %v1082_v48 = vcombine.high %v999_v40, %v2855_v37 }
 0x3a5   : > { %v1089_v50 = vrot.slane %v999_v40, %v2857_v42 }
 0x3a6   : > { %v1039_v51 = vrot.slane %v1031_v46, %v2863_v54  ;;  %v1046_v52 = vrot.slane %v1032_v47, %v2863_v54  ;;  %v1047_v53 = vcombine.low %v1015_v43, %v1030_v45  ;;  %v1048_v56 = vcombine.high %v1015_v43, %v1030_v45 }
 0x3a7   : > { %v1096_v57 = vrot.slane %v1082_v48, %v2857_v42  ;;  %v1097_v58 = vcombine.low %v1074_v49, %v1089_v50  ;;  %v1098_v59 = vcombine.high %v1074_v49, %v1089_v50 }
 0x3a8   : > { %v1055_v60 = vrot.slane %v1047_v53, %v2863_v54  ;;  %v1062_v37 = vrot.slane %v1048_v56, %v2863_v54  ;;  %v1133_v61 = vcombine.low %v1039_v51, %v1046_v52  ;;  %v2041_v36 = vcombine.high %v1039_v51, %v1046_v52  ;;  %v2275_v62 = vpop.eup %2274 }
 0x3a9   : > { %v1105_v63 = vrot.slane %v1097_v58, %v2863_v54  ;;  %v1112_v1 = vrot.slane %v1098_v59, %v2863_v54  ;;  %v1113_v2 = vcombine.low %v1081_v55, %v1096_v57  ;;  %v1114_v3 = vcombine.high %v1081_v55, %v1096_v57 }
 0x3aa   : > { %v2277_v5 = vpop.eup %2276  ;;  %v1140_v6 = vrot.slane %v1133_v61, %v2857_v42  ;;  %v1148_v7 = vrot.slane %v2041_v36, %v2857_v42  ;;  %v1149_v8 = vcombine.low %v1055_v60, %v1062_v37  ;;  %v2042_v10 = vcombine.high %v1055_v60, %v1062_v37 }
 0x3ab   : > { %v1121_v11 = vrot.slane %v1113_v2, %v2863_v54  ;;  %v1128_v13 = vrot.slane %v1114_v3, %v2863_v54  ;;  %v1183_v14 = vcombine.low %v1105_v63, %v1112_v1  ;;  %v2043_v15 = vcombine.high %v1105_v63, %v1112_v1 }
 0x3ac   : > { %v1156_v16 = vrot.slane %v1149_v8, %v2857_v42  ;;  %v1164_v17 = vrot.slane %v2042_v10, %v2857_v42  ;;  %v1459_v18 = vsel %vm1434_vm4, %v2275_v62, 0.0  ;;  %v1462_v19 = vsel %vm1434_vm4, %v2277_v5, 0.0 }
 0x3ad   : > { %v1190_v20 = vrot.slane %v1183_v14, %v2857_v42  ;;  %v1198_v21 = vrot.slane %v2043_v15, %v2857_v42  ;;  %v1199_v22 = vcombine.low %v1121_v11, %v1128_v13  ;;  %v2044_v23 = vcombine.high %v1121_v11, %v1128_v13  ;;  %1460 = vadd.xlane.f32.xlu0 %v1459_v18 }
 0x3ae   : > { %1463 = vadd.xlane.f32.xlu1 %v1462_v19  ;;  %v1165_v24 = vcombine.low %v1140_v6, %v1148_v7  ;;  %v1173_v25 = vcombine.low %v1156_v16, %v1164_v17  ;;  %v1471_v46 = vpack.c.bf16 %v2275_v62, %v2275_v62  ;;  %v1472_v49 = vpack.c.bf16 %v2277_v5, %v2277_v5 }
 0x3af   : > { %v1206_v27 = vrot.slane %v1199_v22, %v2857_v42  ;;  %v1214_v28 = vrot.slane %v2044_v23, %v2857_v42  ;;  %v1215_v29 = vcombine.low %v1190_v20, %v1198_v21 }
 0x3b0   : > { %v1180_v30 = vrot.slane %v1173_v25, %v2863_v54  ;;  %v1172_v31 = vrot.slane %v1165_v24, %v2863_v54 }
 0x3b1   : > { %v1223_v32 = vcombine.low %v1206_v27, %v1214_v28  ;;  %v1222_v34 = vrot.slane %v1215_v29, %v2863_v54 }
 0x3b2   : > { %v1181_v33 = vcombine.low %v1172_v31, %v1180_v30  ;;  %v1182_v43 = vcombine.high %v1172_v31, %v1180_v30 }
 0x3b3   : > { %v1230_v35 = vrot.slane %v1223_v32, %v2863_v54 }
 0x3b4   : > { %v1237_v26 = vshrl.u32 %v1181_v33, 16  ;;  %v1245_v48 = vshrl.u32 %v1182_v43, 16 }
 0x3b5   : > { %v1231_v38 = vcombine.low %v1222_v34, %v1230_v35  ;;  %v1232_v39 = vcombine.high %v1222_v34, %v1230_v35 }
 0x3b7   : > { %v1235_v40 = vpack.i.b16 %v1231_v38, %v1181_v33  ;;  %v1238_v41 = vshrl.u32 %v1231_v38, 16  ;;  %v1246_v45 = vshrl.u32 %v1232_v39, 16  ;;  %v1243_v47 = vpack.i.b16 %v1232_v39, %v1182_v43  ;;  %v2272_v43 = vld [vmem:[#allocation10] sm:$0xff]  }
 0x3b9   : > { %2140 = vmatpush3.bf16.msra.mxu1 %v1235_v40  ;;  %v1239_v44 = vpack.i.b16 %v1238_v41, %v1237_v26  ;;  %v1247_v50 = vpack.i.b16 %v1246_v45, %v1245_v48 }
 0x3ba   : > { %2151 = vmatprep.subr.bf16.mxu1 %v2521_v0 }
 0x3bb   : > { %2146 = vmatpush3.bf16.msra.mxu0 %v1239_v44 }
 0x3bc   : > { %2142 = vmatmul.mubr.msk.bf16.vlgmr.msra.gmra.mrb[12].mxu1 %vm1434_vm4, %v1471_v46  ;;  %2157 = vmatprep.subr.bf16.mxu0 %v2521_v0 }
 0x3bd   : > { %2152 = vmatpush3.bf16.msra.mxu1 %v1243_v47  ;;  %2153 = vmatprep.mubr.msk.bf16.mxu1 %vm2522_vm0, %v2521_v0 }
 0x3be   : > { %2148 = vmatmul.mubr.msk.bf16.vlgmr.msra.gmra.mrb[16].mxu0 %vm1434_vm4, %v1472_v49  ;;  %2163 = vmatprep.subr.bf16.mxu1 %v2521_v0 }
 0x3bf   : > { %2158 = vmatpush3.bf16.msra.mxu0 %v1247_v50  ;;  %2159 = vmatprep.mubr.msk.bf16.mxu0 %vm2522_vm0, %v2521_v0 }
 0x3ce   : > { %v1446_v51 = vpop.xlane.xlu0 %1445 }
 0x3cf   : > { %v1450_v52 = vsub.f32 %v2937_v12, %v1446_v51 }
 0x3d0   : > { %v1443_v53 = vpop.xlane.xlu1 %1442 }
 0x3d1   : > { %v1457_v56 = vmul.f32 1.442695, %v1450_v52  ;;  %v1449_v55 = vsub.f32 %v2935_v9, %v1443_v53 }
 0x3d3   : > { %2278 = vpow2.f32 %v1457_v56  ;;  %v1455_v57 = vmul.f32 1.442695, %v1449_v55 }
 0x3d5   : > { %2280 = vpow2.f32 %v1455_v57 }
 0x3dd   : > { %v2279_v58 = vpop.eup %2278 }
 0x3de   : > { %v1468_v59 = vsel %vm1434_vm4, %v2279_v58, 0.0  ;;  %v1474_v60 = vpack.c.bf16 %v2279_v58, %v2279_v58 }
 0x3df   : > { %v2281_v37 = vpop.eup %2280  ;;  %1469 = vadd.xlane.f32.xlu1 %v1468_v59 }
 0x3e0   : > { %2160 = vmatmul.mubr.msk.bf16.vlgmr.msra.gmra.mrb[20].mxu0 %vm1434_vm4, %v1474_v60  ;;  %v1465_v61 = vsel %vm1434_vm4, %v2281_v37, 0.0  ;;  %v1473_v36 = vpack.c.bf16 %v2281_v37, %v2281_v37  ;;  %v2273_v37 = vld [vmem:[#allocation10 + $0x8] sm:$0xff]  }
 0x3e1   : > { %1466 = vadd.xlane.f32.xlu0 %v1465_v61 }
 0x3e2   : > { %2154 = vmatmul.mubr.msk.bf16.vlgmr.msra.gmra.mrb[16].mxu1 %vm1434_vm4, %v1473_v36 }
 0x3e3   : > { %2167 = vmatprep.mubr.msk.bf16.mxu1 %vm2522_vm0, %v2521_v0  ;;  %2164 = vmatpush3.bf16.msra.mxu1 %v2272_v43 }
 0x3e4   : > { %2165 = vmatprep.subr.bf16.mxu1 %v2521_v0 }
 0x3e7   : > { %2166 = vmatpush3.bf16.msra.mxu1 %v2273_v37 }
 0x43a   : > { %v1461_v7 = vpop.xlane.xlu0 %1460 }
 0x43b   : > { %v1464_v6 = vpop.xlane.xlu1 %1463 }
 0x43c   : > { %2282 = vrcp.f32 %v1464_v6 }
 0x446   : > { %v2283_v11 = vpop.eup %2282 }
 0x46c   : > { %v1470_v8 = vpop.xlane.xlu1 %1469 }
 0x46d   : > { %2284 = vrcp.f32 %v1470_v8 }
 0x46e   : > { %v1467_v10 = vpop.xlane.xlu0 %1466  ;;  %2286 = vrcp.f32 %v1461_v7 }
 0x46f   : > { %2288 = vrcp.f32 %v1467_v10  ;;  %v2055_v10 = vld [vmem:[%s3079_s5] ss:$0 sm:$0xff] }
 0x477   : > { %v2285_v13 = vpop.eup %2284 }
 0x478   : > { %v2287_v15 = vpop.eup %2286 }
 0x479   : > { %v2289_v19 = vpop.eup %2288 }
 0x48f   : > { %v1512_v9 = vpop.f32.mrb[12].mxu1 }
 0x490   : > { %v2143_v12 = vpop.f32.mrb[13].mxu1  ;;  %v1651_v22 = vmul.f32 %v2287_v15, %v1512_v9 }
 0x491   : > { %v1515_v62 = vpop.f32.mrb[14].mxu1  ;;  %v1555_v63 = vpop.f32.mrb[16].mxu0 }
 0x492   : > { %v2144_v1 = vpop.f32.mrb[15].mxu1  ;;  %v2149_v2 = vpop.f32.mrb[17].mxu0  ;;  %v1652_v16 = vmul.f32 %v2283_v11, %v1555_v63 }
 0x493   : > { %v1558_v3 = vpop.f32.mrb[18].mxu0 }
 0x494   : > { %v2150_v5 = vpop.f32.mrb[19].mxu0 }
 0x4b3   : > { %v1641_v14 = vpop.f32.mrb[20].mxu0 }
 0x4b4   : > { %v1654_v17 = vmul.f32 %v2285_v13, %v1641_v14  ;;  %v2161_v18 = vpop.f32.mrb[21].mxu0 }
 0x4b5   : > { %v1598_v20 = vpop.f32.mrb[16].mxu1  ;;  %v1644_v21 = vpop.f32.mrb[22].mxu0 }
 0x4b6   : > { %v1671_v23 = vcombine.low %v1652_v16, %v1654_v17  ;;  %v1672_v24 = vcombine.high %v1652_v16, %v1654_v17  ;;  %v1653_v25 = vmul.f32 %v2289_v19, %v1598_v20  ;;  %v2155_v27 = vpop.f32.mrb[17].mxu1  ;;  %v2162_v28 = vpop.f32.mrb[23].mxu0 }
 0x4b7   : > { %v1601_v29 = vpop.f32.mrb[18].mxu1 }
 0x4b8   : > { %v1655_v30 = vcombine.low %v1651_v22, %v1653_v25  ;;  %v1656_v31 = vcombine.high %v1651_v22, %v1653_v25  ;;  %v2156_v32 = vpop.f32.mrb[19].mxu1  ;;  %v1679_v33 = vrot.slane %v1671_v23, %v2857_v42  ;;  %v1686_v34 = vrot.slane %v1672_v24, %v2857_v42 }
 0x4ba   : > { %v1663_v35 = vrot.slane %v1655_v30, %v2857_v42  ;;  %v1670_v38 = vrot.slane %v1656_v31, %v2857_v42 }
 0x4bc   : > { %v1687_v39 = vcombine.low %v1663_v35, %v1679_v33  ;;  %v1688_v40 = vcombine.high %v1663_v35, %v1679_v33  ;;  %v1703_v26 = vcombine.low %v1670_v38, %v1686_v34  ;;  %v1704_v41 = vcombine.high %v1670_v38, %v1686_v34 }
 0x4be   : > { %v1695_v44 = vrot.slane %v1687_v39, %v2863_v54  ;;  %v1702_v45 = vrot.slane %v1688_v40, %v2863_v54  ;;  %v1711_v46 = vrot.slane %v1703_v26, %v2863_v54  ;;  %v1718_v47 = vrot.slane %v1704_v41, %v2863_v54 }
 0x4c0   : > { %v1723_v48 = vcombine.low %v1695_v44, %v1702_v45  ;;  %v2053_v49 = vcombine.high %v1695_v44, %v1702_v45  ;;  %v1739_v50 = vcombine.low %v1711_v46, %v1718_v47  ;;  %v2054_v51 = vcombine.high %v1711_v46, %v1718_v47 }
 0x4c2   : > { %v1730_v52 = vrot.slane %v1723_v48, %v2857_v42  ;;  %v1738_v53 = vrot.slane %v2053_v49, %v2857_v42  ;;  %v1746_v56 = vrot.slane %v1739_v50, %v2857_v42  ;;  %v1754_v55 = vrot.slane %v2054_v51, %v2857_v42 }
 0x4c4   : > { %v1756_v57 = vcombine.high %v1730_v52, %v1738_v53  ;;  %v1772_v58 = vcombine.high %v1746_v56, %v1754_v55  ;;  %v1755_v59 = vcombine.low %v1730_v52, %v1738_v53  ;;  %v1771_v60 = vcombine.low %v1746_v56, %v1754_v55 }
 0x4c6   : > { %v1770_v61 = vrot.slane %v1756_v57, %v2863_v54  ;;  %v1786_v36 = vrot.slane %v1772_v58, %v2863_v54  ;;  %v1763_v9 = vrot.slane %v1755_v59, %v2863_v54  ;;  %v1779_v0 = vrot.slane %v1771_v60, %v2863_v54 }
 0x4c8   : > { %v1789_v12 = vcombine.low %v1770_v61, %v1786_v36  ;;  %v1788_v62 = vcombine.high %v1763_v9, %v1779_v0  ;;  %v1790_v63 = vcombine.high %v1770_v61, %v1786_v36  ;;  %v1787_v1 = vcombine.low %v1763_v9, %v1779_v0 }
 0x4ca   : > { %1796 = vrot.lane.b32.xlu1 %v1789_v12, %s2529_s16  ;;  %1792 = vrot.lane.b32.xlu0 %v1788_v62, %s2530_s17 }
 0x4ce   : > { %1800 = vrot.lane.b32.xlu1 %v1790_v63, %s2531_s10 }
 0x53c   : > { %v1797_v42 = vpop.permute.xlu1 %1796  ;;  %v1793_v2 = vpop.permute.xlu0 %1792 }
 0x53d   : > { %v1803_v3 = vsel %vm1249_vm3, %v1787_v1, %v1793_v2 }
 0x53e   : > { %v1804_v54 = vsel %vm1434_vm4, %v1803_v3, %v1797_v42 }
 0x540   : > { %v1801_v5 = vpop.permute.xlu1 %1800 }
 0x541   : > { %v1806_v6 = vsel %vm1805_vm5, %v1804_v54, %v1801_v5 }
 0x542   : > { %v1807_v7 = vadd.f32 %v1806_v6, %v2828_v4 }
 0x544   : > { %v1808_v8 = vpack.c.bf16 %v1807_v7, %v1807_v7 }
 0x546   : > { %2168 = vmatmul.mubr.msk.bf16.vlgmr.msra.gmra.mrb[20].mxu1 %vm374_vm2, %v1808_v8 }
 0x619   : > { %v1869_v11 = vpop.f32.mrb[20].mxu1 }
 0x61a   : > { %v1870_v13 = vadd.f32 %v2055_v10, %v1869_v11  ;;  %v2169_v14 = vpop.f32.mrb[21].mxu1 }
 0x61b   : > { %v1872_v4 = vpop.f32.mrb[22].mxu1 }
 0x61c   : > { %v2170_v15 = vpop.f32.mrb[23].mxu1  ;;  %1875 = vst.msk [vmem:[%s346_s26] sm:$0xff] %vm374_vm2, %v1870_v13 }
 0x61d   : > { %2447 = shalt.err (!%p2444_p10)
}
 0x61e   : > { %s2448_s2 = scalar_lea.hbm %s3029_s29, 128  ;;  %s2452_s16 = scalar_lea.hbm %s3080_s6, 256 }
 0x61f   : > { %p2449_p13 = scmp.ne.s32.totalorder %s3029_s29, %s2448_s2  ;;  %p2453_p9 = scmp.lt.u32.totalorder %s3029_s29, %s3080_s6 }
 0x620   : > { %p2454_p3 = scmp.lt.u32.totalorder %s2452_s16, %s2448_s2  ;;  %p2456_p12 = scmp.lt.u32.totalorder %s2448_s2, %s3029_s29 }
 0x621   : > { %p2450_p5 = pnand %p2449_p13, %p3105_p1 }
 0x622   : > { %p2455_p7 = por %p2454_p3, %p2453_p9 }
 0x623   : > { %p2451_p11 = pneg %p2450_p5 }
 0x624   : > { %p2457_p2 = por %p2456_p12, %p2455_p7 }
 0x626   : > { %p2458_p4 = pnand %p2457_p2, %p2451_p11 }
 0x628   : > { %2461 = shalt.err (!%p2458_p4)
}
 0x629   : > { %2187 = dma.vmem_to_hbm [thread:$0]  (%p3105_p1), %s3031_s13, 128, %s3029_s29, %s1877_s25  }
 0x62a PF: > { %s1902_s3 = sand.u32 1, %s2500_s21   ;;  %p3106_p0 = scmp.ne.s32.totalorder %s3089_s28, 0 }
 0x62b   : > { %p3107_p8 = scmp.ge.s32.totalorder %s2512_s24, 2  ;;  %s1903_s12 = scalar_lea.sflag [#allocation4], %s1902_s3 }
 0x62d   : > { %p2207_p6 = pnand %p3107_p8, %p3106_p0 }
 0x62f   : > { %2495 = dma.done.wait (!%p2207_p6), %s1903_s12, 128  }
 0x630   : > { %2497 = vsyncadd (!%p2207_p6), %s1903_s12, 4294967168  ;;  %p23_p10 = scmp.ge.s32.totalorder %s2708_s18, 4   ;;  %s3108_s21 = smov %s2504_s22 }
 0x631   : > { %s3109_s22 = smov %s2508_s23  ;;  %s3110_s23 = smov %s2718_s14 }
 0x632   : > { %s3111_s24 = smov %s2708_s18  ;;  %25 = sbr.rel (!%p23_p10) target bundleno = 12 (0xc), region = 115 }
 0x639   :  { %1908 = vsyncpa [#allocation3], 1 }
 0x63a   :  { %1910 = vsyncpa [#allocation3 + $0x1], 1 }
 0x63b   :  { %1911 = vsyncpa [#allocation6], 1 }
 0x63c   :  { %1913 = vsyncpa [#allocation6 + $0x1], 1 }
 0x63d   :  { %1914 = vsyncpa [#allocation9], 1 }
 0x63e   :  { %1915 = vsyncpa [#allocation4], 1 }
 0x63f   :  { %1917 = vsyncpa [#allocation4 + $0x1], 1 }

</bundles_post_ra>
